<compile_context>
chip_gen: v7x
topology: tpu7x:2x2x1
jax: 0.10.0
libtpu: 0.0.40
codegen_flags: <defaults>
</compile_context>

<pallas_src>
import jax
import jax.numpy as jnp
from jax.experimental import pallas as pl
from jax.experimental.pallas import tpu as pltpu


def bilstm_kernel(maxlen_ref,                      # SMEM scalar prefetch: (1,) int32
                  x_ref,                           # (tT, B, 2E)  [x_fwd | x_rev] time block
                  len_ref,                         # (B, 1) int32 per-row valid lengths
                  wih_ref, whh_ref, b_ref,         # merged weights (2E,8H), (2H,8H), (1,8H)
                  out_ref,                         # (B, 2H) sent_vec
                  gx_s,                            # (tT, B, 8H) hoisted block projection
                  h_s, c_s, a_s):                  # (B, 2H) carries: [fwd | bwd]
    T_blk, B, _ = x_ref.shape
    H8 = whh_ref.shape[1]
    H = H8 // 8
    H2 = 2 * H
    nt = pl.num_programs(0)
    t_blk = pl.program_id(0)
    T_pad = nt * T_blk
    max_len = maxlen_ref[0]

    @pl.when(t_blk == 0)
    def _init():
        h_s[...] = jnp.zeros_like(h_s)
        c_s[...] = jnp.zeros_like(c_s)
        a_s[...] = jnp.zeros_like(a_s)

    # Global time ranges covered by this grid step.
    fwd_start = t_blk * T_blk                       # fwd: [fwd_start, fwd_start+T_blk)
    bwd_first = T_pad - fwd_start - T_blk           # bwd: [bwd_first, bwd_first+T_blk)
    any_valid = jnp.logical_or(fwd_start < max_len, bwd_first < max_len)

    @pl.when(any_valid)
    def _compute():
        # ---- Phase 1: hoisted input projection (+bias) for BOTH directions:
        # one lane-dense matmul per block thanks to the merged (2E, 8H) W_ih
        # and the wrapper-built [x | reverse_time(x)] activation stream.
        xflat = x_ref[...].reshape(T_blk * B, x_ref.shape[2])
        gx_s[...] = (jnp.dot(xflat, wih_ref[...],
                             preferred_element_type=jnp.float32)
                     + b_ref[...]).reshape(T_blk, B, H8)

        whh = whh_ref[...]
        mm_dtype = whh.dtype

        # ---- Hoisted constants (kept OUT of the unrolled loop: JAX does not
        # CSE broadcast_in_dim, so these would otherwise replicate per step).
        lane8 = jax.lax.broadcasted_iota(jnp.int32, (B, H8), 1)
        # Gate-major layout [i_f|i_b|f_f|f_b|g_f|g_b|o_f|o_b]: tanh (g) lanes
        # are the single contiguous range [4H, 6H).
        g_mask = jnp.logical_and(lane8 >= 4 * H, lane8 < 6 * H)
        scale8 = jnp.where(g_mask, 2.0, 1.0)        # tanh(x) = 2*sigmoid(2x)-1
        off8 = jnp.where(g_mask, 1.0, 0.0)
        lane2 = jax.lax.broadcasted_iota(jnp.int32, (B, H2), 1)
        fwd_lane = lane2 < H                        # carry layout [h_f | h_b]
        len_b = jnp.broadcast_to(len_ref[...], (B, H2))   # int32 lengths

        # ---- Phase 2: fused fwd+bwd recurrence (fully unrolled).
        def step(i, carry):
            h, c, a = carry
            # Single recurrent matmul for both directions (block-structured W_hh).
            gates = gx_s[i] + jnp.dot(h.astype(mm_dtype), whh,
                                      preferred_element_type=jnp.float32)
            # ONE sigmoid pass over all 8H gate lanes; g lanes pre-scaled by 2
            # and mapped back with 2*s-1 (halves per-step EUP volume).
            s = jax.nn.sigmoid(gates * scale8)
            act = s * scale8 - off8                 # [ i | f | g | o ] x [fwd|bwd]
            i_g = act[:, 0 * H2:1 * H2]
            f_g = act[:, 1 * H2:2 * H2]
            g_g = act[:, 2 * H2:3 * H2]
            o_g = act[:, 3 * H2:4 * H2]
            c_new = f_g * c + i_g * g_g
            h_new = o_g * jnp.tanh(c_new)
            # In-kernel masks from lengths (padding at the end => masked carry
            # reproduces pack_padded_sequence semantics for both directions).
            t_f = fwd_start + i                     # global fwd time
            t_b = (T_pad - 1) - t_f                 # global bwd time (x_rev row)
            thr = jnp.where(fwd_lane, t_f, t_b)     # (B, 2H) int32
            valid = len_b > thr
            h = jnp.where(valid, h_new, h)
            c = jnp.where(valid, c_new, c)
            a = jnp.where(valid, a + h_new, a)      # masked-sum pooling accumulator
            return (h, c, a)

        h, c, a = jax.lax.fori_loop(0, T_blk, step,
                                    (h_s[...], c_s[...], a_s[...]),
                                    unroll=True)
        h_s[...] = h
        c_s[...] = c
        a_s[...] = a

    @pl.when(t_blk == nt - 1)
    def _finalize():
        # Clamp the denominator: length-0 rows give 0 instead of the 0/0 NaN
        # the PyTorch module would produce (documented divergence).  Exact
        # divide (not approx reciprocal) keeps the correctness check tight.
        denom = jnp.maximum(len_ref[...].astype(jnp.float32), 1.0)
        out_ref[...] = (a_s[...] / denom).astype(out_ref.dtype)


def _merge_bilstm_weights(wih_f, whh_f, b_f, wih_b, whh_b, b_b, H, mm_dtype):
    """Build the gate-major, direction-interleaved merged weights.

    Column layout of all merged matrices: [i_f|i_b|f_f|f_b|g_f|g_b|o_f|o_b].
    W_ih rows 0:E act on x_fwd, rows E:2E on x_rev; W_hh rows 0:H act on h_f,
    rows H:2H on h_b (block-structured, zeros elsewhere).
    """
    E = wih_f.shape[0]
    wih_m = jnp.zeros((2 * E, 8 * H), mm_dtype)
    whh_m = jnp.zeros((2 * H, 8 * H), mm_dtype)
    b_m = jnp.zeros((1, 8 * H), jnp.float32)
    for g in range(4):
        src = slice(g * H, (g + 1) * H)
        cf = slice((2 * g) * H, (2 * g + 1) * H)       # fwd columns of gate g
        cb = slice((2 * g + 1) * H, (2 * g + 2) * H)   # bwd columns of gate g
        wih_m = wih_m.at[:E, cf].set(wih_f[:, src].astype(mm_dtype))
        wih_m = wih_m.at[E:, cb].set(wih_b[:, src].astype(mm_dtype))
        whh_m = whh_m.at[:H, cf].set(whh_f[:, src].astype(mm_dtype))
        whh_m = whh_m.at[H:, cb].set(whh_b[:, src].astype(mm_dtype))
        b_m = b_m.at[:, cf].set(b_f[:, src].astype(jnp.float32))
        b_m = b_m.at[:, cb].set(b_b[:, src].astype(jnp.float32))
    return wih_m, whh_m, b_m


def bilstm_forward(inputs, mask, params, *, time_block=32,
                   matmul_dtype=jnp.float32):
    """Mirrors bilstm.forward: returns (input_vecs, sent_vec).

    Production sizing: grow time_block so tT*B >= 128 (v5e) / 256 (v6e, v7x)
    and keep gx scratch (tT*B*8H*4B) + double-buffered x stream + weights
    inside the scoped VMEM budget (32 MiB here; v7x only has 64 MiB physical).
    Set matmul_dtype=jnp.bfloat16 on v6e/v7x (elementwise math stays f32).
    """
    embed_w = params["embed"]
    input_vecs = jnp.take(embed_w, inputs, axis=0)          # (B, T, E) — XLA glue
    B, T, E = input_vecs.shape
    H = params["whh_f"].shape[0]

    tT = min(time_block, T)
    NT = -(-T // tT)
    T_pad = NT * tT

    # Time-major; pad time to a multiple of the block.  The backward direction
    # consumes a time-reversed copy lane-concatenated with the forward stream,
    # so both directions walk the SAME block/loop index inside the kernel.
    x = jnp.transpose(input_vecs, (1, 0, 2)).astype(matmul_dtype)    # (T, B, E)
    if T_pad != T:
        x = jnp.pad(x, ((0, T_pad - T), (0, 0), (0, 0)))
    xcat = jnp.concatenate([x, jnp.flip(x, axis=0)], axis=-1)        # (T_pad, B, 2E)

    # Per-row valid lengths (mask is contiguous-from-start per module semantics)
    # drive both the in-kernel masks and the pooling denominator.
    lengths = jnp.sum(mask.astype(jnp.float32), axis=1).astype(jnp.int32).reshape(B, 1)
    max_len = jnp.max(lengths).reshape(1)

    wih_m, whh_m, b_m = _merge_bilstm_weights(
        params["wih_f"], params["whh_f"], params["b_f"],
        params["wih_b"], params["whh_b"], params["b_b"], H, matmul_dtype)

    grid_spec = pltpu.PrefetchScalarGridSpec(
        num_scalar_prefetch=1,
        grid=(NT,),
        in_specs=[
            # streamed, double-buffered [x | x_rev] time blocks
            pl.BlockSpec((tT, B, 2 * E), lambda t, ml: (t, 0, 0)),
            # lengths + weights: constant block index -> fetched once, resident
            pl.BlockSpec((B, 1), lambda t, ml: (0, 0)),
            pl.BlockSpec((2 * E, 8 * H), lambda t, ml: (0, 0)),
            pl.BlockSpec((2 * H, 8 * H), lambda t, ml: (0, 0)),
            pl.BlockSpec((1, 8 * H), lambda t, ml: (0, 0)),
        ],
        out_specs=pl.BlockSpec((B, 2 * H), lambda t, ml: (0, 0)),
        scratch_shapes=[
            pltpu.VMEM((tT, B, 8 * H), jnp.float32),   # hoisted gate projections
            pltpu.VMEM((B, 2 * H), jnp.float32),       # h  [fwd | bwd]
            pltpu.VMEM((B, 2 * H), jnp.float32),       # c  [fwd | bwd]
            pltpu.VMEM((B, 2 * H), jnp.float32),       # masked-sum accumulator
        ],
    )

    sent_vec = pl.pallas_call(
        bilstm_kernel,
        out_shape=jax.ShapeDtypeStruct((B, 2 * H), jnp.float32),
        grid_spec=grid_spec,
        compiler_params=pltpu.CompilerParams(
            dimension_semantics=("arbitrary",),        # time carries state
            vmem_limit_bytes=32 * 1024 * 1024),
    )(max_len, xcat, lengths, wih_m, whh_m, b_m)
    return input_vecs, sent_vec


def bilstm_reference(inputs, mask, params):
    """Pure-JAX reference (scan) for correctness checking."""
    embed_w = params["embed"]
    x = jnp.take(embed_w, inputs, axis=0).astype(jnp.float32)
    mask = mask.astype(jnp.float32)
    B, T, E = x.shape
    H = params["whh_f"].shape[0]

    def run(reverse, wih, whh, b):
        def cell(carry, xm):
            h, c = carry
            x_t, m_t = xm
            gates = x_t @ wih + h @ whh + b
            i_g = jax.nn.sigmoid(gates[:, :H])
            f_g = jax.nn.sigmoid(gates[:, H:2 * H])
            g_g = jnp.tanh(gates[:, 2 * H:3 * H])
            o_g = jax.nn.sigmoid(gates[:, 3 * H:])
            c_new = f_g * c + i_g * g_g
            h_new = o_g * jnp.tanh(c_new)
            mm = m_t[:, None]
            h = mm * h_new + (1.0 - mm) * h
            c = mm * c_new + (1.0 - mm) * c
            return (h, c), h

        xs = jnp.transpose(x, (1, 0, 2))
        ms = mask.T
        if reverse:
            xs, ms = xs[::-1], ms[::-1]
        (_, _), hs = jax.lax.scan(
            cell, (jnp.zeros((B, H)), jnp.zeros((B, H))), (xs, ms))
        if reverse:
            hs = hs[::-1]
        return jnp.transpose(hs, (1, 0, 2))                 # (B, T, H)

    hf = run(False, params["wih_f"], params["whh_f"], params["b_f"][0])
    hb = run(True, params["wih_b"], params["whh_b"], params["b_b"][0])
    outs = jnp.concatenate([hf, hb], axis=-1) * mask[:, :, None]
    sent = outs.sum(1) / mask.sum(1, keepdims=True)
    return x, sent


def make_params(key, vocab_size, embed_dim, hidden_size):
    ks = jax.random.split(key, 9)
    u = lambda k, shape: jax.random.uniform(k, shape, jnp.float32, -0.1, 0.1)
    H = hidden_size
    return {
        "embed": u(ks[0], (vocab_size, embed_dim)),
        # forward direction (gate order i, f, g, o; transposed to (in, 4H))
        "wih_f": u(ks[1], (embed_dim, 4 * H)),
        "whh_f": u(ks[2], (H, 4 * H)),
        "b_f":   u(ks[3], (1, 4 * H)),
        # reverse direction
        "wih_b": u(ks[4], (embed_dim, 4 * H)),
        "whh_b": u(ks[5], (H, 4 * H)),
        "b_b":   u(ks[6], (1, 4 * H)),
    }


if __name__ == "__main__":
    vocab_size, embed_dim, hidden_size = 50, 32, 32
    B, T = 8, 12                      # B=8: full f32 sublane group per vreg

    key = jax.random.PRNGKey(0)
    kp, ki = jax.random.split(key)
    params = make_params(kp, vocab_size, embed_dim, hidden_size)

    inputs = jax.random.randint(ki, (B, T), 0, vocab_size, dtype=jnp.int32)
    lengths = jnp.array([12, 5, 9, 12, 3, 7, 1, 10], dtype=jnp.int32)
    mask = (jnp.arange(T)[None, :] < lengths[:, None]).astype(jnp.float32)
    inputs = inputs * mask.astype(jnp.int32)        # pad token = 0

    # time_block=8 keeps NT=2 so the cross-block carry path is exercised.
    # matmul_dtype=jnp.bfloat16 is the production setting on v6e/v7x; the demo
    # keeps f32 so the comparison against the f32 reference stays tight.
    input_vecs, sent_vec = bilstm_forward(inputs, mask, params,
                                          time_block=8,
                                          matmul_dtype=jnp.float32)
    jax.block_until_ready((input_vecs, sent_vec))

    ref_vecs, ref_sent = bilstm_reference(inputs, mask, params)
    assert jnp.allclose(input_vecs, ref_vecs, atol=1e-5), "embedding mismatch"
    # Kernel computes tanh(g) as 2*sigmoid(2g)-1 (algebraically identical).
    assert jnp.allclose(sent_vec, ref_sent, atol=1e-4), "sent_vec mismatch"

    print("KERNEL_OK")
</pallas_src>

<mosaic_0001>
module attributes {stable_mosaic.version = 11 : i64} {
  func.func @bilstm_kernel(%arg0: i32, %arg1: memref<1xi32, #tpu.memory_space<smem>>, %arg2: memref<8x8x64xf32, #tpu.memory_space<vmem>>, %arg3: memref<8x1xi32, #tpu.memory_space<vmem>>, %arg4: memref<64x256xf32, #tpu.memory_space<vmem>>, %arg5: memref<64x256xf32, #tpu.memory_space<vmem>>, %arg6: memref<1x256xf32, #tpu.memory_space<vmem>>, %arg7: memref<8x64xf32, #tpu.memory_space<vmem>>, %arg8: memref<8x8x256xf32, #tpu.memory_space<vmem>>, %arg9: memref<8x64xf32, #tpu.memory_space<vmem>>, %arg10: memref<8x64xf32, #tpu.memory_space<vmem>>, %arg11: memref<8x64xf32, #tpu.memory_space<vmem>>) attributes {dimension_semantics = [#tpu.dimension_semantics<arbitrary>], iteration_bounds = array<i64: 2>, scalar_prefetch = 1 : i64, scratch_operands = 4 : i64, tpu.core_type = #tpu.core_type<tc>, window_params = [{transform_indices = @transform_0, window_bounds = array<i64: 8, 8, 64>}, {pipeline_mode = #tpu.pipeline_mode<synchronous>, transform_indices = @transform_1, window_bounds = array<i64: 8, 1>}, {pipeline_mode = #tpu.pipeline_mode<synchronous>, transform_indices = @transform_2, window_bounds = array<i64: 64, 256>}, {pipeline_mode = #tpu.pipeline_mode<synchronous>, transform_indices = @transform_3, window_bounds = array<i64: 64, 256>}, {pipeline_mode = #tpu.pipeline_mode<synchronous>, transform_indices = @transform_4, window_bounds = array<i64: 1, 256>}, {pipeline_mode = #tpu.pipeline_mode<synchronous>, transform_indices = @transform_5, window_bounds = array<i64: 8, 64>}]} {
    %c0 = arith.constant 0 : index
    %0 = memref.load %arg1[%c0] : memref<1xi32, #tpu.memory_space<smem>>
    %c0_i32 = arith.constant 0 : i32
    %1 = arith.cmpi eq, %arg0, %c0_i32 : i32
    %2 = arith.extui %1 : i1 to i32
    %c0_i32_0 = arith.constant 0 : i32
    %3 = arith.cmpi ne, %2, %c0_i32_0 : i32
    scf.if %3 {
      %cst = arith.constant 0.000000e+00 : f32
      %15 = vector.broadcast %cst : f32 to vector<8x64xf32>
      %c0_4 = arith.constant 0 : index
      %c0_5 = arith.constant 0 : index
      %16 = vector.load %arg9[%c0_4, %c0_5] : memref<8x64xf32, #tpu.memory_space<vmem>>, vector<8x64xf32>
      tpu.vector_store %arg9[%c0_4, %c0_5], %15 {strides = array<i32>} : memref<8x64xf32, #tpu.memory_space<vmem>>, vector<8x64xf32>,
      %cst_6 = arith.constant 0.000000e+00 : f32
      %17 = vector.broadcast %cst_6 : f32 to vector<8x64xf32>
      %c0_7 = arith.constant 0 : index
      %c0_8 = arith.constant 0 : index
      %18 = vector.load %arg10[%c0_7, %c0_8] : memref<8x64xf32, #tpu.memory_space<vmem>>, vector<8x64xf32>
      tpu.vector_store %arg10[%c0_7, %c0_8], %17 {strides = array<i32>} : memref<8x64xf32, #tpu.memory_space<vmem>>, vector<8x64xf32>,
      %cst_9 = arith.constant 0.000000e+00 : f32
      %19 = vector.broadcast %cst_9 : f32 to vector<8x64xf32>
      %c0_10 = arith.constant 0 : index
      %c0_11 = arith.constant 0 : index
      %20 = vector.load %arg11[%c0_10, %c0_11] : memref<8x64xf32, #tpu.memory_space<vmem>>, vector<8x64xf32>
      tpu.vector_store %arg11[%c0_10, %c0_11], %19 {strides = array<i32>} : memref<8x64xf32, #tpu.memory_space<vmem>>, vector<8x64xf32>,
    } else {
    }
    %c8_i32 = arith.constant 8 : i32
    %4 = arith.muli %arg0, %c8_i32 : i32
    %c16_i32 = arith.constant 16 : i32
    %5 = arith.subi %c16_i32, %4 : i32
    %c8_i32_1 = arith.constant 8 : i32
    %6 = arith.subi %5, %c8_i32_1 : i32
    %7 = arith.cmpi slt, %4, %0 : i32
    %8 = arith.cmpi slt, %6, %0 : i32
    %9 = arith.ori %7, %8 : i1
    %10 = arith.extui %9 : i1 to i32
    %c0_i32_2 = arith.constant 0 : i32
    %11 = arith.cmpi ne, %10, %c0_i32_2 : i32
    scf.if %11 {
      %c0_4 = arith.constant 0 : index
      %c0_5 = arith.constant 0 : index
      %c0_6 = arith.constant 0 : index
      %15 = vector.load %arg2[%c0_4, %c0_5, %c0_6] : memref<8x8x64xf32, #tpu.memory_space<vmem>>, vector<8x8x64xf32>
      %16 = vector.shape_cast %15 : vector<8x8x64xf32> to vector<64x64xf32>
      %c0_7 = arith.constant 0 : index
      %c0_8 = arith.constant 0 : index
      %17 = vector.load %arg4[%c0_7, %c0_8] : memref<64x256xf32, #tpu.memory_space<vmem>>, vector<64x256xf32>
      %cst = arith.constant dense<0.000000e+00> : vector<64x256xf32>
      %18 = tpu.matmul %16, %17, %cst {dimension_numbers = #tpu.dot_dimension_numbers<[1], [0], [0], [1], [0, 0, 1, 1], [], []>} : vector<64x64xf32>, vector<64x256xf32>, vector<64x256xf32> -> vector<64x256xf32>
      %c0_9 = arith.constant 0 : index
      %c0_10 = arith.constant 0 : index
      %19 = vector.load %arg6[%c0_9, %c0_10] : memref<1x256xf32, #tpu.memory_space<vmem>>, vector<1x256xf32>
      %20 = vector.broadcast %19 : vector<1x256xf32> to vector<64x256xf32>
      %21 = arith.addf %18, %20 : vector<64x256xf32>
      %22 = vector.shape_cast %21 : vector<64x256xf32> to vector<8x8x256xf32>
      %c0_11 = arith.constant 0 : index
      %c0_12 = arith.constant 0 : index
      %c0_13 = arith.constant 0 : index
      %23 = vector.load %arg8[%c0_11, %c0_12, %c0_13] : memref<8x8x256xf32, #tpu.memory_space<vmem>>, vector<8x8x256xf32>
      tpu.vector_store %arg8[%c0_11, %c0_12, %c0_13], %22 {strides = array<i32>} : memref<8x8x256xf32, #tpu.memory_space<vmem>>, vector<8x8x256xf32>,
      %c0_14 = arith.constant 0 : index
      %c0_15 = arith.constant 0 : index
      %24 = vector.load %arg5[%c0_14, %c0_15] : memref<64x256xf32, #tpu.memory_space<vmem>>, vector<64x256xf32>
      %25 = tpu.iota {dimensions = array<i32: 1>} : vector<8x256xi32>
      %c128_i32 = arith.constant 128 : i32
      %26 = vector.broadcast %c128_i32 : i32 to vector<8x256xi32>
      %27 = arith.cmpi sge, %25, %26 : vector<8x256xi32>
      %c192_i32 = arith.constant 192 : i32
      %28 = vector.broadcast %c192_i32 : i32 to vector<8x256xi32>
      %29 = arith.cmpi slt, %25, %28 : vector<8x256xi32>
      %30 = arith.andi %27, %29 : vector<8x256xi1>
      %cst_16 = arith.constant 2.000000e+00 : f32
      %cst_17 = arith.constant 1.000000e+00 : f32
      %31 = vector.broadcast %cst_16 : f32 to vector<8x256xf32>
      %32 = vector.broadcast %cst_17 : f32 to vector<8x256xf32>
      %33 = arith.select %30, %31, %32 : vector<8x256xi1>, vector<8x256xf32>
      %cst_18 = arith.constant 1.000000e+00 : f32
      %cst_19 = arith.constant 0.000000e+00 : f32
      %34 = vector.broadcast %cst_18 : f32 to vector<8x256xf32>
      %35 = vector.broadcast %cst_19 : f32 to vector<8x256xf32>
      %36 = arith.select %30, %34, %35 : vector<8x256xi1>, vector<8x256xf32>
      %37 = tpu.iota {dimensions = array<i32: 1>} : vector<8x64xi32>
      %c32_i32 = arith.constant 32 : i32
      %38 = vector.broadcast %c32_i32 : i32 to vector<8x64xi32>
      %39 = arith.cmpi slt, %37, %38 : vector<8x64xi32>
      %c0_20 = arith.constant 0 : index
      %c0_21 = arith.constant 0 : index
      %40 = vector.load %arg3[%c0_20, %c0_21] : memref<8x1xi32, #tpu.memory_space<vmem>>, vector<8x1xi32>
      %41 = vector.shape_cast %40 : vector<8x1xi32> to vector<8x1xi32>
      %42 = vector.broadcast %41 : vector<8x1xi32> to vector<8x64xi32>
      %c0_22 = arith.constant 0 : index
      %c0_23 = arith.constant 0 : index
      %43 = vector.load %arg9[%c0_22, %c0_23] : memref<8x64xf32, #tpu.memory_space<vmem>>, vector<8x64xf32>
      %c0_24 = arith.constant 0 : index
      %c0_25 = arith.constant 0 : index
      %44 = vector.load %arg10[%c0_24, %c0_25] : memref<8x64xf32, #tpu.memory_space<vmem>>, vector<8x64xf32>
      %c0_26 = arith.constant 0 : index
      %c0_27 = arith.constant 0 : index
      %45 = vector.load %arg11[%c0_26, %c0_27] : memref<8x64xf32, #tpu.memory_space<vmem>>, vector<8x64xf32>
      %c0_i32_28 = arith.constant 0 : i32
      %46 = arith.index_cast %c0_i32_28 : i32 to index
      %c0_29 = arith.constant 0 : index
      %c0_30 = arith.constant 0 : index
      %47 = vector.load %arg8[%46, %c0_29, %c0_30] : memref<8x8x256xf32, #tpu.memory_space<vmem>>, vector<1x8x256xf32>
      %48 = vector.shape_cast %47 : vector<1x8x256xf32> to vector<8x256xf32>
      %cst_31 = arith.constant dense<0.000000e+00> : vector<8x256xf32>
      %49 = tpu.matmul %43, %24, %cst_31 {dimension_numbers = #tpu.dot_dimension_numbers<[1], [0], [0], [1], [0, 0, 1, 1], [], []>} : vector<8x64xf32>, vector<64x256xf32>, vector<8x256xf32> -> vector<8x256xf32>
      %50 = arith.addf %48, %49 : vector<8x256xf32>
      %51 = arith.mulf %50, %33 : vector<8x256xf32>
      %52 = arith.negf %51 : vector<8x256xf32>
      %53 = math.exp %52 : vector<8x256xf32>
      %cst_32 = arith.constant 1.000000e+00 : f32
      %54 = vector.broadcast %cst_32 : f32 to vector<8x256xf32>
      %55 = arith.addf %54, %53 : vector<8x256xf32>
      %56 = arith.divf %54, %55 : vector<8x256xf32>
      %57 = arith.mulf %56, %33 : vector<8x256xf32>
      %58 = arith.subf %57, %36 : vector<8x256xf32>
      %59 = vector.extract_strided_slice %58 {offsets = [0, 0], sizes = [8, 64], strides = [1, 1]} : vector<8x256xf32> to vector<8x64xf32>
      %60 = vector.extract_strided_slice %58 {offsets = [0, 64], sizes = [8, 64], strides = [1, 1]} : vector<8x256xf32> to vector<8x64xf32>
      %61 = vector.extract_strided_slice %58 {offsets = [0, 128], sizes = [8, 64], strides = [1, 1]} : vector<8x256xf32> to vector<8x64xf32>
      %62 = vector.extract_strided_slice %58 {offsets = [0, 192], sizes = [8, 64], strides = [1, 1]} : vector<8x256xf32> to vector<8x64xf32>
      %63 = arith.mulf %60, %44 : vector<8x64xf32>
      %64 = arith.mulf %59, %61 : vector<8x64xf32>
      %65 = arith.addf %63, %64 : vector<8x64xf32>
      %66 = math.tanh %65 : vector<8x64xf32>
      %67 = arith.mulf %62, %66 : vector<8x64xf32>
      %68 = arith.addi %4, %c0_i32_28 : i32
      %c15_i32 = arith.constant 15 : i32
      %69 = arith.subi %c15_i32, %68 : i32
      %70 = vector.broadcast %68 : i32 to vector<8x64xi32>
      %71 = vector.broadcast %69 : i32 to vector<8x64xi32>
      %72 = arith.select %39, %70, %71 : vector<8x64xi1>, vector<8x64xi32>
      %73 = arith.cmpi sgt, %42, %72 : vector<8x64xi32>
      %74 = arith.select %73, %67, %43 : vector<8x64xi1>, vector<8x64xf32>
      %75 = arith.select %73, %65, %44 : vector<8x64xi1>, vector<8x64xf32>
      %76 = arith.addf %45, %67 : vector<8x64xf32>
      %77 = arith.select %73, %76, %45 : vector<8x64xi1>, vector<8x64xf32>
      %c1_i32_33 = arith.constant 1 : i32
      %78 = arith.index_cast %c1_i32_33 : i32 to index
      %c0_34 = arith.constant 0 : index
      %c0_35 = arith.constant 0 : index
      %79 = vector.load %arg8[%78, %c0_34, %c0_35] : memref<8x8x256xf32, #tpu.memory_space<vmem>>, vector<1x8x256xf32>
      %80 = vector.shape_cast %79 : vector<1x8x256xf32> to vector<8x256xf32>
      %cst_36 = arith.constant dense<0.000000e+00> : vector<8x256xf32>
      %81 = tpu.matmul %74, %24, %cst_36 {dimension_numbers = #tpu.dot_dimension_numbers<[1], [0], [0], [1], [0, 0, 1, 1], [], []>} : vector<8x64xf32>, vector<64x256xf32>, vector<8x256xf32> -> vector<8x256xf32>
      %82 = arith.addf %80, %81 : vector<8x256xf32>
      %83 = arith.mulf %82, %33 : vector<8x256xf32>
      %84 = arith.negf %83 : vector<8x256xf32>
      %85 = math.exp %84 : vector<8x256xf32>
      %cst_37 = arith.constant 1.000000e+00 : f32
      %86 = vector.broadcast %cst_37 : f32 to vector<8x256xf32>
      %87 = arith.addf %86, %85 : vector<8x256xf32>
      %88 = arith.divf %86, %87 : vector<8x256xf32>
      %89 = arith.mulf %88, %33 : vector<8x256xf32>
      %90 = arith.subf %89, %36 : vector<8x256xf32>
      %91 = vector.extract_strided_slice %90 {offsets = [0, 0], sizes = [8, 64], strides = [1, 1]} : vector<8x256xf32> to vector<8x64xf32>
      %92 = vector.extract_strided_slice %90 {offsets = [0, 64], sizes = [8, 64], strides = [1, 1]} : vector<8x256xf32> to vector<8x64xf32>
      %93 = vector.extract_strided_slice %90 {offsets = [0, 128], sizes = [8, 64], strides = [1, 1]} : vector<8x256xf32> to vector<8x64xf32>
      %94 = vector.extract_strided_slice %90 {offsets = [0, 192], sizes = [8, 64], strides = [1, 1]} : vector<8x256xf32> to vector<8x64xf32>
      %95 = arith.mulf %92, %75 : vector<8x64xf32>
      %96 = arith.mulf %91, %93 : vector<8x64xf32>
      %97 = arith.addf %95, %96 : vector<8x64xf32>
      %98 = math.tanh %97 : vector<8x64xf32>
      %99 = arith.mulf %94, %98 : vector<8x64xf32>
      %100 = arith.addi %4, %c1_i32_33 : i32
      %c15_i32_38 = arith.constant 15 : i32
      %101 = arith.subi %c15_i32_38, %100 : i32
      %102 = vector.broadcast %100 : i32 to vector<8x64xi32>
      %103 = vector.broadcast %101 : i32 to vector<8x64xi32>
      %104 = arith.select %39, %102, %103 : vector<8x64xi1>, vector<8x64xi32>
      %105 = arith.cmpi sgt, %42, %104 : vector<8x64xi32>
      %106 = arith.select %105, %99, %74 : vector<8x64xi1>, vector<8x64xf32>
      %107 = arith.select %105, %97, %75 : vector<8x64xi1>, vector<8x64xf32>
      %108 = arith.addf %77, %99 : vector<8x64xf32>
      %109 = arith.select %105, %108, %77 : vector<8x64xi1>, vector<8x64xf32>
      %c2_i32 = arith.constant 2 : i32
      %110 = arith.index_cast %c2_i32 : i32 to index
      %c0_39 = arith.constant 0 : index
      %c0_40 = arith.constant 0 : index
      %111 = vector.load %arg8[%110, %c0_39, %c0_40] : memref<8x8x256xf32, #tpu.memory_space<vmem>>, vector<1x8x256xf32>
      %112 = vector.shape_cast %111 : vector<1x8x256xf32> to vector<8x256xf32>
      %cst_41 = arith.constant dense<0.000000e+00> : vector<8x256xf32>
      %113 = tpu.matmul %106, %24, %cst_41 {dimension_numbers = #tpu.dot_dimension_numbers<[1], [0], [0], [1], [0, 0, 1, 1], [], []>} : vector<8x64xf32>, vector<64x256xf32>, vector<8x256xf32> -> vector<8x256xf32>
      %114 = arith.addf %112, %113 : vector<8x256xf32>
      %115 = arith.mulf %114, %33 : vector<8x256xf32>
      %116 = arith.negf %115 : vector<8x256xf32>
      %117 = math.exp %116 : vector<8x256xf32>
      %cst_42 = arith.constant 1.000000e+00 : f32
      %118 = vector.broadcast %cst_42 : f32 to vector<8x256xf32>
      %119 = arith.addf %118, %117 : vector<8x256xf32>
      %120 = arith.divf %118, %119 : vector<8x256xf32>
      %121 = arith.mulf %120, %33 : vector<8x256xf32>
      %122 = arith.subf %121, %36 : vector<8x256xf32>
      %123 = vector.extract_strided_slice %122 {offsets = [0, 0], sizes = [8, 64], strides = [1, 1]} : vector<8x256xf32> to vector<8x64xf32>
      %124 = vector.extract_strided_slice %122 {offsets = [0, 64], sizes = [8, 64], strides = [1, 1]} : vector<8x256xf32> to vector<8x64xf32>
      %125 = vector.extract_strided_slice %122 {offsets = [0, 128], sizes = [8, 64], strides = [1, 1]} : vector<8x256xf32> to vector<8x64xf32>
      %126 = vector.extract_strided_slice %122 {offsets = [0, 192], sizes = [8, 64], strides = [1, 1]} : vector<8x256xf32> to vector<8x64xf32>
      %127 = arith.mulf %124, %107 : vector<8x64xf32>
      %128 = arith.mulf %123, %125 : vector<8x64xf32>
      %129 = arith.addf %127, %128 : vector<8x64xf32>
      %130 = math.tanh %129 : vector<8x64xf32>
      %131 = arith.mulf %126, %130 : vector<8x64xf32>
      %132 = arith.addi %4, %c2_i32 : i32
      %c15_i32_43 = arith.constant 15 : i32
      %133 = arith.subi %c15_i32_43, %132 : i32
      %134 = vector.broadcast %132 : i32 to vector<8x64xi32>
      %135 = vector.broadcast %133 : i32 to vector<8x64xi32>
      %136 = arith.select %39, %134, %135 : vector<8x64xi1>, vector<8x64xi32>
      %137 = arith.cmpi sgt, %42, %136 : vector<8x64xi32>
      %138 = arith.select %137, %131, %106 : vector<8x64xi1>, vector<8x64xf32>
      %139 = arith.select %137, %129, %107 : vector<8x64xi1>, vector<8x64xf32>
      %140 = arith.addf %109, %131 : vector<8x64xf32>
      %141 = arith.select %137, %140, %109 : vector<8x64xi1>, vector<8x64xf32>
      %c3_i32 = arith.constant 3 : i32
      %142 = arith.index_cast %c3_i32 : i32 to index
      %c0_44 = arith.constant 0 : index
      %c0_45 = arith.constant 0 : index
      %143 = vector.load %arg8[%142, %c0_44, %c0_45] : memref<8x8x256xf32, #tpu.memory_space<vmem>>, vector<1x8x256xf32>
      %144 = vector.shape_cast %143 : vector<1x8x256xf32> to vector<8x256xf32>
      %cst_46 = arith.constant dense<0.000000e+00> : vector<8x256xf32>
      %145 = tpu.matmul %138, %24, %cst_46 {dimension_numbers = #tpu.dot_dimension_numbers<[1], [0], [0], [1], [0, 0, 1, 1], [], []>} : vector<8x64xf32>, vector<64x256xf32>, vector<8x256xf32> -> vector<8x256xf32>
      %146 = arith.addf %144, %145 : vector<8x256xf32>
      %147 = arith.mulf %146, %33 : vector<8x256xf32>
      %148 = arith.negf %147 : vector<8x256xf32>
      %149 = math.exp %148 : vector<8x256xf32>
      %cst_47 = arith.constant 1.000000e+00 : f32
      %150 = vector.broadcast %cst_47 : f32 to vector<8x256xf32>
      %151 = arith.addf %150, %149 : vector<8x256xf32>
      %152 = arith.divf %150, %151 : vector<8x256xf32>
      %153 = arith.mulf %152, %33 : vector<8x256xf32>
      %154 = arith.subf %153, %36 : vector<8x256xf32>
      %155 = vector.extract_strided_slice %154 {offsets = [0, 0], sizes = [8, 64], strides = [1, 1]} : vector<8x256xf32> to vector<8x64xf32>
      %156 = vector.extract_strided_slice %154 {offsets = [0, 64], sizes = [8, 64], strides = [1, 1]} : vector<8x256xf32> to vector<8x64xf32>
      %157 = vector.extract_strided_slice %154 {offsets = [0, 128], sizes = [8, 64], strides = [1, 1]} : vector<8x256xf32> to vector<8x64xf32>
      %158 = vector.extract_strided_slice %154 {offsets = [0, 192], sizes = [8, 64], strides = [1, 1]} : vector<8x256xf32> to vector<8x64xf32>
      %159 = arith.mulf %156, %139 : vector<8x64xf32>
      %160 = arith.mulf %155, %157 : vector<8x64xf32>
      %161 = arith.addf %159, %160 : vector<8x64xf32>
      %162 = math.tanh %161 : vector<8x64xf32>
      %163 = arith.mulf %158, %162 : vector<8x64xf32>
      %164 = arith.addi %4, %c3_i32 : i32
      %c15_i32_48 = arith.constant 15 : i32
      %165 = arith.subi %c15_i32_48, %164 : i32
      %166 = vector.broadcast %164 : i32 to vector<8x64xi32>
      %167 = vector.broadcast %165 : i32 to vector<8x64xi32>
      %168 = arith.select %39, %166, %167 : vector<8x64xi1>, vector<8x64xi32>
      %169 = arith.cmpi sgt, %42, %168 : vector<8x64xi32>
      %170 = arith.select %169, %163, %138 : vector<8x64xi1>, vector<8x64xf32>
      %171 = arith.select %169, %161, %139 : vector<8x64xi1>, vector<8x64xf32>
      %172 = arith.addf %141, %163 : vector<8x64xf32>
      %173 = arith.select %169, %172, %141 : vector<8x64xi1>, vector<8x64xf32>
      %c4_i32 = arith.constant 4 : i32
      %174 = arith.index_cast %c4_i32 : i32 to index
      %c0_49 = arith.constant 0 : index
      %c0_50 = arith.constant 0 : index
      %175 = vector.load %arg8[%174, %c0_49, %c0_50] : memref<8x8x256xf32, #tpu.memory_space<vmem>>, vector<1x8x256xf32>
      %176 = vector.shape_cast %175 : vector<1x8x256xf32> to vector<8x256xf32>
      %cst_51 = arith.constant dense<0.000000e+00> : vector<8x256xf32>
      %177 = tpu.matmul %170, %24, %cst_51 {dimension_numbers = #tpu.dot_dimension_numbers<[1], [0], [0], [1], [0, 0, 1, 1], [], []>} : vector<8x64xf32>, vector<64x256xf32>, vector<8x256xf32> -> vector<8x256xf32>
      %178 = arith.addf %176, %177 : vector<8x256xf32>
      %179 = arith.mulf %178, %33 : vector<8x256xf32>
      %180 = arith.negf %179 : vector<8x256xf32>
      %181 = math.exp %180 : vector<8x256xf32>
      %cst_52 = arith.constant 1.000000e+00 : f32
      %182 = vector.broadcast %cst_52 : f32 to vector<8x256xf32>
      %183 = arith.addf %182, %181 : vector<8x256xf32>
      %184 = arith.divf %182, %183 : vector<8x256xf32>
      %185 = arith.mulf %184, %33 : vector<8x256xf32>
      %186 = arith.subf %185, %36 : vector<8x256xf32>
      %187 = vector.extract_strided_slice %186 {offsets = [0, 0], sizes = [8, 64], strides = [1, 1]} : vector<8x256xf32> to vector<8x64xf32>
      %188 = vector.extract_strided_slice %186 {offsets = [0, 64], sizes = [8, 64], strides = [1, 1]} : vector<8x256xf32> to vector<8x64xf32>
      %189 = vector.extract_strided_slice %186 {offsets = [0, 128], sizes = [8, 64], strides = [1, 1]} : vector<8x256xf32> to vector<8x64xf32>
      %190 = vector.extract_strided_slice %186 {offsets = [0, 192], sizes = [8, 64], strides = [1, 1]} : vector<8x256xf32> to vector<8x64xf32>
      %191 = arith.mulf %188, %171 : vector<8x64xf32>
      %192 = arith.mulf %187, %189 : vector<8x64xf32>
      %193 = arith.addf %191, %192 : vector<8x64xf32>
      %194 = math.tanh %193 : vector<8x64xf32>
      %195 = arith.mulf %190, %194 : vector<8x64xf32>
      %196 = arith.addi %4, %c4_i32 : i32
      %c15_i32_53 = arith.constant 15 : i32
      %197 = arith.subi %c15_i32_53, %196 : i32
      %198 = vector.broadcast %196 : i32 to vector<8x64xi32>
      %199 = vector.broadcast %197 : i32 to vector<8x64xi32>
      %200 = arith.select %39, %198, %199 : vector<8x64xi1>, vector<8x64xi32>
      %201 = arith.cmpi sgt, %42, %200 : vector<8x64xi32>
      %202 = arith.select %201, %195, %170 : vector<8x64xi1>, vector<8x64xf32>
      %203 = arith.select %201, %193, %171 : vector<8x64xi1>, vector<8x64xf32>
      %204 = arith.addf %173, %195 : vector<8x64xf32>
      %205 = arith.select %201, %204, %173 : vector<8x64xi1>, vector<8x64xf32>
      %c5_i32 = arith.constant 5 : i32
      %206 = arith.index_cast %c5_i32 : i32 to index
      %c0_54 = arith.constant 0 : index
      %c0_55 = arith.constant 0 : index
      %207 = vector.load %arg8[%206, %c0_54, %c0_55] : memref<8x8x256xf32, #tpu.memory_space<vmem>>, vector<1x8x256xf32>
      %208 = vector.shape_cast %207 : vector<1x8x256xf32> to vector<8x256xf32>
      %cst_56 = arith.constant dense<0.000000e+00> : vector<8x256xf32>
      %209 = tpu.matmul %202, %24, %cst_56 {dimension_numbers = #tpu.dot_dimension_numbers<[1], [0], [0], [1], [0, 0, 1, 1], [], []>} : vector<8x64xf32>, vector<64x256xf32>, vector<8x256xf32> -> vector<8x256xf32>
      %210 = arith.addf %208, %209 : vector<8x256xf32>
      %211 = arith.mulf %210, %33 : vector<8x256xf32>
      %212 = arith.negf %211 : vector<8x256xf32>
      %213 = math.exp %212 : vector<8x256xf32>
      %cst_57 = arith.constant 1.000000e+00 : f32
      %214 = vector.broadcast %cst_57 : f32 to vector<8x256xf32>
      %215 = arith.addf %214, %213 : vector<8x256xf32>
      %216 = arith.divf %214, %215 : vector<8x256xf32>
      %217 = arith.mulf %216, %33 : vector<8x256xf32>
      %218 = arith.subf %217, %36 : vector<8x256xf32>
      %219 = vector.extract_strided_slice %218 {offsets = [0, 0], sizes = [8, 64], strides = [1, 1]} : vector<8x256xf32> to vector<8x64xf32>
      %220 = vector.extract_strided_slice %218 {offsets = [0, 64], sizes = [8, 64], strides = [1, 1]} : vector<8x256xf32> to vector<8x64xf32>
      %221 = vector.extract_strided_slice %218 {offsets = [0, 128], sizes = [8, 64], strides = [1, 1]} : vector<8x256xf32> to vector<8x64xf32>
      %222 = vector.extract_strided_slice %218 {offsets = [0, 192], sizes = [8, 64], strides = [1, 1]} : vector<8x256xf32> to vector<8x64xf32>
      %223 = arith.mulf %220, %203 : vector<8x64xf32>
      %224 = arith.mulf %219, %221 : vector<8x64xf32>
      %225 = arith.addf %223, %224 : vector<8x64xf32>
      %226 = math.tanh %225 : vector<8x64xf32>
      %227 = arith.mulf %222, %226 : vector<8x64xf32>
      %228 = arith.addi %4, %c5_i32 : i32
      %c15_i32_58 = arith.constant 15 : i32
      %229 = arith.subi %c15_i32_58, %228 : i32
      %230 = vector.broadcast %228 : i32 to vector<8x64xi32>
      %231 = vector.broadcast %229 : i32 to vector<8x64xi32>
      %232 = arith.select %39, %230, %231 : vector<8x64xi1>, vector<8x64xi32>
      %233 = arith.cmpi sgt, %42, %232 : vector<8x64xi32>
      %234 = arith.select %233, %227, %202 : vector<8x64xi1>, vector<8x64xf32>
      %235 = arith.select %233, %225, %203 : vector<8x64xi1>, vector<8x64xf32>
      %236 = arith.addf %205, %227 : vector<8x64xf32>
      %237 = arith.select %233, %236, %205 : vector<8x64xi1>, vector<8x64xf32>
      %c6_i32 = arith.constant 6 : i32
      %238 = arith.index_cast %c6_i32 : i32 to index
      %c0_59 = arith.constant 0 : index
      %c0_60 = arith.constant 0 : index
      %239 = vector.load %arg8[%238, %c0_59, %c0_60] : memref<8x8x256xf32, #tpu.memory_space<vmem>>, vector<1x8x256xf32>
      %240 = vector.shape_cast %239 : vector<1x8x256xf32> to vector<8x256xf32>
      %cst_61 = arith.constant dense<0.000000e+00> : vector<8x256xf32>
      %241 = tpu.matmul %234, %24, %cst_61 {dimension_numbers = #tpu.dot_dimension_numbers<[1], [0], [0], [1], [0, 0, 1, 1], [], []>} : vector<8x64xf32>, vector<64x256xf32>, vector<8x256xf32> -> vector<8x256xf32>
      %242 = arith.addf %240, %241 : vector<8x256xf32>
      %243 = arith.mulf %242, %33 : vector<8x256xf32>
      %244 = arith.negf %243 : vector<8x256xf32>
      %245 = math.exp %244 : vector<8x256xf32>
      %cst_62 = arith.constant 1.000000e+00 : f32
      %246 = vector.broadcast %cst_62 : f32 to vector<8x256xf32>
      %247 = arith.addf %246, %245 : vector<8x256xf32>
      %248 = arith.divf %246, %247 : vector<8x256xf32>
      %249 = arith.mulf %248, %33 : vector<8x256xf32>
      %250 = arith.subf %249, %36 : vector<8x256xf32>
      %251 = vector.extract_strided_slice %250 {offsets = [0, 0], sizes = [8, 64], strides = [1, 1]} : vector<8x256xf32> to vector<8x64xf32>
      %252 = vector.extract_strided_slice %250 {offsets = [0, 64], sizes = [8, 64], strides = [1, 1]} : vector<8x256xf32> to vector<8x64xf32>
      %253 = vector.extract_strided_slice %250 {offsets = [0, 128], sizes = [8, 64], strides = [1, 1]} : vector<8x256xf32> to vector<8x64xf32>
      %254 = vector.extract_strided_slice %250 {offsets = [0, 192], sizes = [8, 64], strides = [1, 1]} : vector<8x256xf32> to vector<8x64xf32>
      %255 = arith.mulf %252, %235 : vector<8x64xf32>
      %256 = arith.mulf %251, %253 : vector<8x64xf32>
      %257 = arith.addf %255, %256 : vector<8x64xf32>
      %258 = math.tanh %257 : vector<8x64xf32>
      %259 = arith.mulf %254, %258 : vector<8x64xf32>
      %260 = arith.addi %4, %c6_i32 : i32
      %c15_i32_63 = arith.constant 15 : i32
      %261 = arith.subi %c15_i32_63, %260 : i32
      %262 = vector.broadcast %260 : i32 to vector<8x64xi32>
      %263 = vector.broadcast %261 : i32 to vector<8x64xi32>
      %264 = arith.select %39, %262, %263 : vector<8x64xi1>, vector<8x64xi32>
      %265 = arith.cmpi sgt, %42, %264 : vector<8x64xi32>
      %266 = arith.select %265, %259, %234 : vector<8x64xi1>, vector<8x64xf32>
      %267 = arith.select %265, %257, %235 : vector<8x64xi1>, vector<8x64xf32>
      %268 = arith.addf %237, %259 : vector<8x64xf32>
      %269 = arith.select %265, %268, %237 : vector<8x64xi1>, vector<8x64xf32>
      %c7_i32 = arith.constant 7 : i32
      %270 = arith.index_cast %c7_i32 : i32 to index
      %c0_64 = arith.constant 0 : index
      %c0_65 = arith.constant 0 : index
      %271 = vector.load %arg8[%270, %c0_64, %c0_65] : memref<8x8x256xf32, #tpu.memory_space<vmem>>, vector<1x8x256xf32>
      %272 = vector.shape_cast %271 : vector<1x8x256xf32> to vector<8x256xf32>
      %cst_66 = arith.constant dense<0.000000e+00> : vector<8x256xf32>
      %273 = tpu.matmul %266, %24, %cst_66 {dimension_numbers = #tpu.dot_dimension_numbers<[1], [0], [0], [1], [0, 0, 1, 1], [], []>} : vector<8x64xf32>, vector<64x256xf32>, vector<8x256xf32> -> vector<8x256xf32>
      %274 = arith.addf %272, %273 : vector<8x256xf32>
      %275 = arith.mulf %274, %33 : vector<8x256xf32>
      %276 = arith.negf %275 : vector<8x256xf32>
      %277 = math.exp %276 : vector<8x256xf32>
      %cst_67 = arith.constant 1.000000e+00 : f32
      %278 = vector.broadcast %cst_67 : f32 to vector<8x256xf32>
      %279 = arith.addf %278, %277 : vector<8x256xf32>
      %280 = arith.divf %278, %279 : vector<8x256xf32>
      %281 = arith.mulf %280, %33 : vector<8x256xf32>
      %282 = arith.subf %281, %36 : vector<8x256xf32>
      %283 = vector.extract_strided_slice %282 {offsets = [0, 0], sizes = [8, 64], strides = [1, 1]} : vector<8x256xf32> to vector<8x64xf32>
      %284 = vector.extract_strided_slice %282 {offsets = [0, 64], sizes = [8, 64], strides = [1, 1]} : vector<8x256xf32> to vector<8x64xf32>
      %285 = vector.extract_strided_slice %282 {offsets = [0, 128], sizes = [8, 64], strides = [1, 1]} : vector<8x256xf32> to vector<8x64xf32>
      %286 = vector.extract_strided_slice %282 {offsets = [0, 192], sizes = [8, 64], strides = [1, 1]} : vector<8x256xf32> to vector<8x64xf32>
      %287 = arith.mulf %284, %267 : vector<8x64xf32>
      %288 = arith.mulf %283, %285 : vector<8x64xf32>
      %289 = arith.addf %287, %288 : vector<8x64xf32>
      %290 = math.tanh %289 : vector<8x64xf32>
      %291 = arith.mulf %286, %290 : vector<8x64xf32>
      %292 = arith.addi %4, %c7_i32 : i32
      %c15_i32_68 = arith.constant 15 : i32
      %293 = arith.subi %c15_i32_68, %292 : i32
      %294 = vector.broadcast %292 : i32 to vector<8x64xi32>
      %295 = vector.broadcast %293 : i32 to vector<8x64xi32>
      %296 = arith.select %39, %294, %295 : vector<8x64xi1>, vector<8x64xi32>
      %297 = arith.cmpi sgt, %42, %296 : vector<8x64xi32>
      %298 = arith.select %297, %291, %266 : vector<8x64xi1>, vector<8x64xf32>
      %299 = arith.select %297, %289, %267 : vector<8x64xi1>, vector<8x64xf32>
      %300 = arith.addf %269, %291 : vector<8x64xf32>
      %301 = arith.select %297, %300, %269 : vector<8x64xi1>, vector<8x64xf32>
      %c8_i32_69 = arith.constant 8 : i32
      %c0_70 = arith.constant 0 : index
      %c0_71 = arith.constant 0 : index
      %302 = vector.load %arg9[%c0_70, %c0_71] : memref<8x64xf32, #tpu.memory_space<vmem>>, vector<8x64xf32>
      tpu.vector_store %arg9[%c0_70, %c0_71], %298 {strides = array<i32>} : memref<8x64xf32, #tpu.memory_space<vmem>>, vector<8x64xf32>,
      %c0_72 = arith.constant 0 : index
      %c0_73 = arith.constant 0 : index
      %303 = vector.load %arg10[%c0_72, %c0_73] : memref<8x64xf32, #tpu.memory_space<vmem>>, vector<8x64xf32>
      tpu.vector_store %arg10[%c0_72, %c0_73], %299 {strides = array<i32>} : memref<8x64xf32, #tpu.memory_space<vmem>>, vector<8x64xf32>,
      %c0_74 = arith.constant 0 : index
      %c0_75 = arith.constant 0 : index
      %304 = vector.load %arg11[%c0_74, %c0_75] : memref<8x64xf32, #tpu.memory_space<vmem>>, vector<8x64xf32>
      tpu.vector_store %arg11[%c0_74, %c0_75], %301 {strides = array<i32>} : memref<8x64xf32, #tpu.memory_space<vmem>>, vector<8x64xf32>,
    } else {
    }
    %c1_i32 = arith.constant 1 : i32
    %12 = arith.cmpi eq, %arg0, %c1_i32 : i32
    %13 = arith.extui %12 : i1 to i32
    %c0_i32_3 = arith.constant 0 : i32
    %14 = arith.cmpi ne, %13, %c0_i32_3 : i32
    scf.if %14 {
      %c0_4 = arith.constant 0 : index
      %c0_5 = arith.constant 0 : index
      %15 = vector.load %arg3[%c0_4, %c0_5] : memref<8x1xi32, #tpu.memory_space<vmem>>, vector<8x1xi32>
      %16 = arith.sitofp %15 : vector<8x1xi32> to vector<8x1xf32>
      %cst = arith.constant 1.000000e+00 : f32
      %17 = vector.broadcast %cst : f32 to vector<8x1xf32>
      %18 = arith.maximumf %16, %17 : vector<8x1xf32>
      %c0_6 = arith.constant 0 : index
      %c0_7 = arith.constant 0 : index
      %19 = vector.load %arg11[%c0_6, %c0_7] : memref<8x64xf32, #tpu.memory_space<vmem>>, vector<8x64xf32>
      %20 = vector.broadcast %18 : vector<8x1xf32> to vector<8x64xf32>
      %21 = arith.divf %19, %20 : vector<8x64xf32>
      %c0_8 = arith.constant 0 : index
      %c0_9 = arith.constant 0 : index
      %22 = vector.load %arg7[%c0_8, %c0_9] : memref<8x64xf32, #tpu.memory_space<vmem>>, vector<8x64xf32>
      tpu.vector_store %arg7[%c0_8, %c0_9], %21 {strides = array<i32>} : memref<8x64xf32, #tpu.memory_space<vmem>>, vector<8x64xf32>,
    } else {
    }
    return
  }
  func.func @transform_0(%arg0: i32, %arg1: memref<1xi32, #tpu.memory_space<smem>>) -> (i32, i32, i32) {
    %c0_i32 = arith.constant 0 : i32
    %c0_i32_0 = arith.constant 0 : i32
    %c0_i32_1 = arith.constant 0 : i32
    return %arg0, %c0_i32, %c0_i32_0 : i32, i32, i32
  }
  func.func @transform_1(%arg0: i32, %arg1: memref<1xi32, #tpu.memory_space<smem>>) -> (i32, i32) {
    %c0_i32 = arith.constant 0 : i32
    %c0_i32_0 = arith.constant 0 : i32
    %c0_i32_1 = arith.constant 0 : i32
    return %c0_i32, %c0_i32_0 : i32, i32
  }
  func.func @transform_2(%arg0: i32, %arg1: memref<1xi32, #tpu.memory_space<smem>>) -> (i32, i32) {
    %c0_i32 = arith.constant 0 : i32
    %c0_i32_0 = arith.constant 0 : i32
    %c0_i32_1 = arith.constant 0 : i32
    return %c0_i32, %c0_i32_0 : i32, i32
  }
  func.func @transform_3(%arg0: i32, %arg1: memref<1xi32, #tpu.memory_space<smem>>) -> (i32, i32) {
    %c0_i32 = arith.constant 0 : i32
    %c0_i32_0 = arith.constant 0 : i32
    %c0_i32_1 = arith.constant 0 : i32
    return %c0_i32, %c0_i32_0 : i32, i32
  }
  func.func @transform_4(%arg0: i32, %arg1: memref<1xi32, #tpu.memory_space<smem>>) -> (i32, i32) {
    %c0_i32 = arith.constant 0 : i32
    %c0_i32_0 = arith.constant 0 : i32
    %c0_i32_1 = arith.constant 0 : i32
    return %c0_i32, %c0_i32_0 : i32, i32
  }
  func.func @transform_5(%arg0: i32, %arg1: memref<1xi32, #tpu.memory_space<smem>>) -> (i32, i32) {
    %c0_i32 = arith.constant 0 : i32
    %c0_i32_0 = arith.constant 0 : i32
    %c0_i32_1 = arith.constant 0 : i32
    return %c0_i32, %c0_i32_0 : i32, i32
  }
}

</mosaic_0001>

<bundles_post_ra>
// kernel: tpu_custom_call.1
= control target key start
LH: loop header
LB: loop body
LE: loop exit
PB: predicated region body
PF: predicated region fallthrough
CT: control target
= control target key end

     0   :  { %s2734_s0 = inlined_call_operand.<no memory space> [shape: s32[1], index: 0, kind: input, shape index: {}]   ;;  %s2735_s1 = inlined_call_operand.hbm [shape: f32[16,8,64], index: 1, kind: input, shape index: {}]   ;;  %s2736_s2 = inlined_call_operand.vmem [shape: s32[8,1], index: 2, kind: input, shape index: {}]   ;;  %s2737_s3 = inlined_call_operand.hbm [shape: f32[64,256], index: 3, kind: input, shape index: {}]   ;;  %s2738_s4 = inlined_call_operand.hbm [shape: f32[64,256], index: 4, kind: input, shape index: {}]   ;;  %s2739_s5 = inlined_call_operand.vmem [shape: f32[1,256], index: 5, kind: input, shape index: {}]   ;;  %s2740_s6 = inlined_call_operand.hbm [shape: f32[8,64], index: 6, kind: output, shape index: {}]  }
   0x1   :  { %11 = sst [smem:[#allocation7]] %s2734_s0 }
   0x2   :  { %12 = vsyncpa [#allocation9], 0 }
   0x3   :  { %14 = vsyncpa [#allocation9 + $0x1], 0 }
   0x4   :  { %15 = vsyncpa [#allocation12], 0 }
   0x5   :  { %16 = vsyncpa [#allocation10], 0  ;;  %s2222_s23 = smov 0   ;;  %s2224_s24 = smov 0  }
   0x6   :  { %s2226_s25 = smov 0   ;;  %s2228_s26 = smov 0  }
   0x7 LB: > { %s2241_s0 = sadd.s32 4294967295, %s2168_s26   ;;  %p42_p0 = scmp.ne.s32.totalorder %s2160_s24, %s2156_s23  ;;  %s2168_s26 = sphi %s2228_s26, %s2756_s26   ;;  %s2164_s25 = sphi %s2226_s25, %s2755_s25   ;;  %s2160_s24 = sphi %s2224_s24, %s2754_s24   ;;  %s2156_s23 = sphi %s2222_s23, %s2753_s23  }
   0x8   : > { %p2741_p1 = scmp.eq.s32.totalorder %s2241_s0, 0  ;;  %p1625_p2 = scmp.ge.s32.totalorder %s2168_s26, 1 }
   0x9   : > { %p158_p3 = scmp.lt.s32.totalorder %s2168_s26, 3  ;;  %s2170_s29 = smov [#allocation11]  }
   0xa   : > { %p2250_p5 = por %p2741_p1, %p42_p0  ;;  %s173_s30 = sshll.u32 %s2170_s29, 4  ;;  %s174_s30 = int_to_ptr.vmem [resolvable:$true] %s173_s30 }
   0xb   : > { %p2254_p6 = pnand %p1625_p2, %p158_p3  ;;  %s2171_s8 = smov [#allocation13]  }
   0xc   : > { %s2744_s27 = scalar_select %p2250_p5, 1, 0 }
   0xd   : > { %s2745_s28 = scalar_select %p2254_p6, 1, 0 }
   0xe   : > { %p1866_p7 = pneg %p2254_p6  ;;  %s186_s9 = sshll.u32 %s2171_s8, 4  ;;  %s2266_s9 = int_to_ptr.vmem [resolvable:$true] %s186_s9 }
   0xf   : > { %s2014_s12 = scalar_lea.hbm %s2737_s3, 2048 }
  0x10   : > { %p2262_p8 = pnand %p1866_p7, %p2741_p1  ;;  %p2015_p9 = scmp.ne.s32.totalorder %s2737_s3, %s2014_s12 }
  0x11   : > { %p2021_p13 = scmp.lt.u32.totalorder %s2014_s12, %s2737_s3 }
  0x12   : > { %p2016_p10 = pneg %p2262_p8 }
  0x14   : > { %p2017_p11 = pnand %p2016_p10, %p2015_p9 }
  0x16   : > { %p2018_p12 = pneg %p2017_p11 }
  0x18   : > { %p2023_p0 = pnand %p2021_p13, %p2018_p12 }
  0x1a   : > { %2026 = shalt.err (!%p2023_p0)
}
  0x1b   : > { %s2027_s17 = scalar_lea.vmem %s174_s30, 2048  ;;  %p2035_p4 = scmp.lt.s32.totalorder %s174_s30, %s174_s30 }
  0x1c   : > { %p2028_p2 = scmp.ne.s32.totalorder %s174_s30, %s2027_s17  ;;  %p2036_p1 = scmp.lt.s32.totalorder %s2027_s17, %s2027_s17 }
  0x1e   : > { %p2030_p3 = pnand %p2028_p2, %p2016_p10  ;;  %p2037_p5 = por %p2036_p1, %p2035_p4 }
  0x20   : > { %p2031_p7 = pneg %p2030_p3 }
  0x22   : > { %p2038_p6 = pnand %p2037_p5, %p2031_p7 }
  0x24   : > { %2041 = shalt.err (!%p2038_p6)
}
  0x25   : > { %s2172_s18 = smov 256   ;;  %s2173_s19 = smov 16  }
  0x26   : > { %1869 = dma.hbm_to_vmem [thread:$0]  (!%p2262_p8), %s2737_s3, 2048, %s174_s30, [#allocation12], %s2172_s18, %s2172_s18, %s2173_s19  }
  0x27   : > { %s2042_s29 = scalar_lea.hbm %s2738_s4, 2048 }
  0x28   : > { %p2043_p9 = scmp.ne.s32.totalorder %s2738_s4, %s2042_s29  ;;  %p2049_p5 = scmp.lt.u32.totalorder %s2042_s29, %s2738_s4 }
  0x2a   : > { %p2045_p1 = pnand %p2043_p9, %p2016_p10 }
  0x2c   : > { %p2046_p4 = pneg %p2045_p1 }
  0x2e   : > { %p2051_p6 = pnand %p2049_p5, %p2046_p4 }
  0x30   : > { %2054 = shalt.err (!%p2051_p6)
}
  0x31   : > { %s2055_s30 = scalar_lea.vmem %s2266_s9, 2048  ;;  %p2063_p0 = scmp.lt.s32.totalorder %s2266_s9, %s2266_s9 }
  0x32   : > { %p2056_p11 = scmp.ne.s32.totalorder %s2266_s9, %s2055_s30  ;;  %p2064_p2 = scmp.lt.s32.totalorder %s2055_s30, %s2055_s30 }
  0x34   : > { %p2058_p12 = pnand %p2056_p11, %p2016_p10  ;;  %p2065_p3 = por %p2064_p2, %p2063_p0 }
  0x36   : > { %p2059_p13 = pneg %p2058_p12 }
  0x38   : > { %p2066_p7 = pnand %p2065_p3, %p2059_p13 }
  0x3a   : > { %2069 = shalt.err (!%p2066_p7)
}
  0x3b   : > { %1872 = dma.hbm_to_vmem [thread:$0]  (!%p2262_p8), %s2738_s4, 2048, %s2266_s9, [#allocation12], %s2172_s18, %s2172_s18, %s2173_s19  }
  0x3c   : > { %s2316_s15 = sadd.s32 1, %s2168_s26   ;;  %s29_s16 = sadd.s32 1, %s2164_s25 }
  0x3d   : > { %s26_s7 = ssub.s32 %s2168_s26, %s2316_s15  ;;  %p36_p10 = scmp.ne.s32.totalorder %s2164_s25, %s2160_s24 }
  0x3e   : > { %p27_p9 = scmp.eq.s32.totalorder %s26_s7, 0  ;;  %p37_p1 = scmp.eq.s32.totalorder %s2168_s26, 0 }
  0x3f   : > { %p1879_p4 = scmp.lt.s32.totalorder %s2168_s26, 2  ;;  %s203_s17 = sand.u32 1, %s2164_s25  }
  0x40   : > { %s2327_s20 = scalar_select %p27_p9, %s2164_s25, %s29_s16  }
  0x41   : > { %p38_p5 = por %p37_p1, %p36_p10  ;;  %s1629_s21 = sshll.u32 %s203_s17, 6 }
  0x42   : > { %s1675_s22 = sshll.u32 %s2168_s26, 10  ;;  %s207_s9 = scalar_lea.vmem [#allocation8], %s1629_s21 }
  0x43   : > { %s2333_s8 = scalar_lea.hbm %s2735_s1, %s1675_s22  ;;  %s214_s18 = sshll.u32 %s207_s9, 4  ;;  %s2339_s18 = int_to_ptr.vmem [resolvable:$true] %s214_s18 }
  0x44   : > { %p2335_p8 = pnand %p1879_p4, %p38_p5  ;;  %s2341_s26 = scalar_lea.sflag [#allocation9], %s203_s17 }
  0x45   : > { %s2070_s10 = scalar_lea.hbm %s2333_s8, 1024  ;;  %s2075_s30 = scalar_lea.hbm %s2735_s1, 2048 }
  0x46   : > { %p2071_p6 = scmp.ne.s32.totalorder %s2333_s8, %s2070_s10  ;;  %p2072_p11 = pneg %p2335_p8 }
  0x47   : > { %p2076_p0 = scmp.lt.u32.totalorder %s2333_s8, %s2735_s1  ;;  %p2077_p2 = scmp.lt.u32.totalorder %s2075_s30, %s2070_s10 }
  0x48   : > { %p2073_p12 = pnand %p2072_p11, %p2071_p6  ;;  %p2079_p7 = scmp.lt.u32.totalorder %s2070_s10, %s2333_s8 }
  0x49   : > { %p2078_p3 = por %p2077_p2, %p2076_p0 }
  0x4a   : > { %p2074_p13 = pneg %p2073_p12 }
  0x4b   : > { %p2080_p10 = por %p2079_p7, %p2078_p3 }
  0x4d   : > { %p2081_p9 = pnand %p2080_p10, %p2074_p13 }
  0x4f   : > { %2084 = shalt.err (!%p2081_p9)
}
  0x50   : > { %s2085_s16 = scalar_lea.vmem %s2339_s18, 1024  ;;  %s2174_s7 = smov [#allocation8]  }
  0x51   : > { %p2086_p1 = scmp.ne.s32.totalorder %s2339_s18, %s2085_s16  ;;  %s2090_s17 = sshll.u32 %s2174_s7, 4  ;;  %s2091_s17 = int_to_ptr.vmem [resolvable:$false] %s2090_s17 }
  0x52   : > { %s2092_s21 = scalar_lea.vmem %s2091_s17, 2048  ;;  %p2093_p6 = scmp.lt.s32.totalorder %s2339_s18, %s2091_s17 }
  0x53   : > { %p2088_p4 = pnand %p2086_p1, %p2072_p11  ;;  %p2094_p12 = scmp.lt.s32.totalorder %s2092_s21, %s2085_s16 }
  0x55   : > { %p2089_p5 = pneg %p2088_p4  ;;  %p2095_p0 = por %p2094_p12, %p2093_p6 }
  0x57   : > { %p2096_p2 = pnand %p2095_p0, %p2089_p5 }
  0x59   : > { %2099 = shalt.err (!%p2096_p2)
}
  0x5a   : > { %s2175_s22 = smov 128   ;;  %s2176_s23 = smov 8  }
  0x5b   : > { %1876 = dma.hbm_to_vmem [thread:$0]  (!%p2335_p8), %s2333_s8, 1024, %s2339_s18, %s2341_s26, %s2175_s22, %s2175_s22, %s2176_s23  }
  0x5c   : > { %p2748_p11 = scmp.ne.s32.totalorder %s2745_s28, 0 }
  0x5d   : > { %s228_s29 = sand.u32 (!%p2748_p11), 1, %s2160_s24   ;;  %p2749_p13 = scmp.ne.s32.totalorder (!%p2748_p11), %s2744_s27, 0 }
  0x5e   : > { %226 = sbr.rel (%p2748_p11) target bundleno = 4306 (0x10d2), region = 40  ;;  %s1633_s9 = sshll.u32 (!%p2748_p11), %s228_s29, 6 }
  0x5f   : > { %s229_s10 = scalar_lea.sflag (!%p2748_p11), [#allocation9], %s228_s29  ;;  %s2372_s11 = scalar_lea.vmem (!%p2748_p11), [#allocation8], %s1633_s9 }
  0x65   : > { %2143 = dma.done.wait (%p2749_p13), %s229_s10, 1024  }
  0x66   : > { %2145 = vsyncadd (%p2749_p13), %s229_s10, 4294966272  ;;  %p2750_p3 = scmp.eq.s32.totalorder %s2241_s0, 0 }
  0x68   : > { %2147 = dma.done.wait (%p2750_p3), [#allocation12], 4096   ;;  %p2751_p8 = pmov %p2750_p3 }
  0x69   : > { %s263_s28 = sld [smem:[#allocation7]]  ;;  %p2752_p7 = scmp.ne.s32.totalorder %s2241_s0, 0 }
  0x6a   : > { %2149 = vsyncadd (%p2751_p8), [#allocation12], 4294963200  ;;  %vm268_vm0 = vcmask (!%p2752_p7), 523264   ;;  %v2177_v0 = vmov (!%p2752_p7), 0.0  }
  0x6b   : > { %267 = sbr.rel (%p2752_p7) target bundleno = 114 (0x72), region = 56  ;;  %269 = vst.msk [vmem:[#allocation3] sm:$0xff] (!%p2752_p7), %vm268_vm0, %v2177_v0  ;;  %270 = vst.msk [vmem:[#allocation4] sm:$0xff] (!%p2752_p7), %vm268_vm0, %v2177_v0 }
  0x6c   : > { %271 = vst.msk [vmem:[#allocation5] sm:$0xff] (!%p2752_p7), %vm268_vm0, %v2177_v0 }
  0x72 PF: > { %s2385_s8 = sshll.u32 %s2241_s0, 3 }
  0x73   : > { %s273_s27 = ssub.s32 8, %s2385_s8  ;;  %p274_p10 = scmp.lt.s32.totalorder %s2385_s8, %s263_s28 }
  0x74   : > { %p275_p9 = scmp.lt.s32.totalorder %s273_s27, %s263_s28 }
  0x76   : > { %p276_p1 = por %p275_p9, %p274_p10 }
  0x77   : > { %v289_v1 = vld [vmem:[#allocation11 + $0x8] sm:$0xff] (%p276_p1)  ;;  %v291_v2 = vld [vmem:[#allocation11 + $0x18] sm:$0xff] (%p276_p1)  ;;  %v288_v3 = vld [vmem:[#allocation11] sm:$0xff] (%p276_p1)  ;;  %v2178_v8 = vmov (%p276_p1), 0.0   ;;  %s2179_s18 = smov (%p276_p1), 64   ;;  %vm316_vm1 = vcmask (%p276_p1), 523264  }
  0x78   : > { %279 = sbr.rel (!%p276_p1) target bundleno = 4133 (0x1025), region = 60  ;;  %v1676_v4 = vpack.c.bf16 (%p276_p1), %v291_v2, %v289_v1  ;;  %v290_v5 = vld [vmem:[#allocation11 + $0x10] sm:$0xff] (%p276_p1)  ;;  %v293_v6 = vld [vmem:[#allocation11 + $0x28] sm:$0xff] (%p276_p1)  ;;  %v295_v7 = vld [vmem:[#allocation11 + $0x38] sm:$0xff] (%p276_p1)  ;;  %405 = vmatprep.mubr.f32.mxu1 (%p276_p1), %v2178_v8  ;;  %959 = vmatprep.mubr.f32.mxu0 (%p276_p1), %v2178_v8  ;;  %v2180_v61 = vmov (%p276_p1), 0   ;;  %v306_v2 = vlaneseq (%p276_p1)  ;;  %s616_s13 = ssub.s32 (%p276_p1), 15, %s2385_s8 }
  0x79   : > { %v1678_v9 = vpack.c.bf16 (%p276_p1), %v290_v5, %v288_v3  ;;  %v1680_v10 = vpack.c.bf16 (%p276_p1), %v295_v7, %v293_v6  ;;  %v292_v11 = vld [vmem:[#allocation11 + $0x20] sm:$0xff] (%p276_p1)  ;;  %v294_v12 = vld [vmem:[#allocation11 + $0x30] sm:$0xff] (%p276_p1)  ;;  %v297_v13 = vld [vmem:[#allocation11 + $0x48] sm:$0xff] (%p276_p1)  ;;  %1929 = vset.pattern.permute.xlu1 (%p276_p1), %v2180_v61  ;;  %1930 = vset.pattern.permute.xlu0 (%p276_p1), %v2180_v61  ;;  %s743_s14 = sadd.s32 (%p276_p1), 1, %s2385_s8  ;;  %s744_s16 = ssub.s32 (%p276_p1), 14, %s2385_s8 }
  0x7a   : > { %1677 = vmatprep.subr.bf16.mxu1 (%p276_p1), %v1676_v4  ;;  %v299_v14 = vld [vmem:[#allocation11 + $0x58] sm:$0xff] (%p276_p1)  ;;  %v1682_v15 = vpack.c.bf16 (%p276_p1), %v294_v12, %v292_v11  ;;  %v296_v16 = vld [vmem:[#allocation11 + $0x40] sm:$0xff] (%p276_p1)  ;;  %v298_v17 = vld [vmem:[#allocation11 + $0x50] sm:$0xff] (%p276_p1)  ;;  %v2483_v5 = vand.u32 (%p276_p1), 127, %v306_v2  ;;  %v307_v6 = vshrl.u32 (%p276_p1), %v306_v2, 7  ;;  %s871_s7 = sadd.s32 (%p276_p1), 2, %s2385_s8 }
  0x7b   : > { %1679 = vmatpush1.bf16.msra.mxu1 (%p276_p1), %v1678_v9  ;;  %v1684_v18 = vpack.c.bf16 (%p276_p1), %v299_v14, %v297_v13  ;;  %v301_v19 = vld [vmem:[#allocation11 + $0x68] sm:$0xff] (%p276_p1)  ;;  %v303_v20 = vld [vmem:[#allocation11 + $0x78] sm:$0xff] (%p276_p1)  ;;  %v470_v23 = vld [vmem:[#allocation13] sm:$0xff] (%p276_p1)  ;;  %v1686_v27 = vpack.c.bf16 (%p276_p1), %v298_v17, %v296_v16  ;;  %s872_s17 = ssub.s32 (%p276_p1), 13, %s2385_s8  ;;  %s999_s21 = sadd.s32 (%p276_p1), 3, %s2385_s8 }
  0x7c   : > { %1681 = vmatprep.subr.bf16.mxu1 (%p276_p1), %v1680_v10  ;;  %v471_v21 = vld [vmem:[#allocation13 + $0x8] sm:$0xff] (%p276_p1)  ;;  %v473_v22 = vld [vmem:[#allocation13 + $0x18] sm:$0xff] (%p276_p1)  ;;  %v472_v24 = vld [vmem:[#allocation13 + $0x10] sm:$0xff] (%p276_p1)  ;;  %v1688_v31 = vpack.c.bf16 (%p276_p1), %v303_v20, %v301_v19  ;;  %v488_v10 = vadd.s32 (%p276_p1), 128, %v2483_v5  ;;  %v308_v11 = vsub.s32 (%p276_p1), 0, %v307_v6  ;;  %v312_v13 = vsub.s32 (%p276_p1), 1, %v307_v6 }
  0x7d   : > { %v2393_v25 = vpack.c.bf16 (%p276_p1), %v473_v22, %v471_v21  ;;  %v475_v26 = vld [vmem:[#allocation13 + $0x28] sm:$0xff] (%p276_p1)  ;;  %v300_v28 = vld [vmem:[#allocation11 + $0x60] sm:$0xff] (%p276_p1)  ;;  %v2395_v29 = vpack.c.bf16 (%p276_p1), %v472_v24, %v470_v23  ;;  %v477_v30 = vld [vmem:[#allocation13 + $0x38] sm:$0xff] (%p276_p1)  ;;  %v2181_v20 = vmov (%p276_p1), 1.0   ;;  %vm499_vm3 = vcmp.lt.s32.totalorder (%p276_p1), %v2483_v5, 32  ;;  %s1000_s22 = ssub.s32 (%p276_p1), 12, %s2385_s8 }
  0x7e   : > { %v302_v32 = vld [vmem:[#allocation11 + $0x70] sm:$0xff] (%p276_p1)  ;;  %v2397_v33 = vpack.c.bf16 (%p276_p1), %v477_v30, %v475_v26  ;;  %v474_v34 = vld [vmem:[#allocation13 + $0x20] sm:$0xff] (%p276_p1)  ;;  %v479_v36 = vld [vmem:[#allocation13 + $0x48] sm:$0xff] (%p276_p1)  ;;  %vm492_vm2 = vcmp.lt.s32.totalorder (%p276_p1), %v488_v10, 192  ;;  %s1127_s23 = sadd.s32 (%p276_p1), 4, %s2385_s8  ;;  %s1128_s29 = ssub.s32 (%p276_p1), 11, %s2385_s8 }
  0x7f   : > { %1683 = vmatpush1.bf16.msra.mxu1 %v1682_v15  ;;  %v476_v35 = vld [vmem:[#allocation13 + $0x30] sm:$0xff]  ;;  %1741 = vmatprep.subr.bf16.mxu0 %v2393_v25  ;;  %v481_v37 = vld [vmem:[#allocation13 + $0x58] sm:$0xff]  ;;  %v1690_v38 = vpack.c.bf16 %v302_v32, %v300_v28  ;;  %v478_v41 = vld [vmem:[#allocation13 + $0x40] sm:$0xff]  ;;  %v2503_v21 = vsel %vm492_vm2, 2.0, %v2181_v20  ;;  %s1255_s9 = sadd.s32 5, %s2385_s8  ;;  %s1256_s10 = ssub.s32 10, %s2385_s8 }
  0x80   : > { %1685 = vmatprep.subr.bf16.mxu1 %v1684_v18  ;;  %1743 = vmatpush1.bf16.msra.mxu0 %v2395_v29  ;;  %v2402_v39 = vpack.c.bf16 %v476_v35, %v474_v34  ;;  %v2404_v40 = vpack.c.bf16 %v481_v37, %v479_v36  ;;  %v480_v42 = vld [vmem:[#allocation13 + $0x50] sm:$0xff]  ;;  %v483_v44 = vld [vmem:[#allocation13 + $0x68] sm:$0xff]  ;;  %v485_v45 = vld [vmem:[#allocation13 + $0x78] sm:$0xff]  ;;  %v2509_v35 = vsel %vm492_vm2, 1.0, %v2178_v8  ;;  %s1384_s28 = ssub.s32 9, %s2385_s8  ;;  %s1511_s19 = sadd.s32 7, %s2385_s8 }
  0x81   : > { %1745 = vmatprep.subr.bf16.mxu0 %v2397_v33  ;;  %v2406_v43 = vld [vmem:[#allocation4] sm:$0xff]  ;;  %v280_v46 = vld [vmem:[%s2372_s11] sm:$0xff]  ;;  %v2413_v47 = vpack.c.bf16 %v480_v42, %v478_v41  ;;  %v2416_v48 = vpack.c.bf16 %v485_v45, %v483_v44  ;;  %v281_v51 = vld [vmem:[%s2372_s11 + $0x8] sm:$0xff] }
  0x82   : > { %604 = vrot.lane.b32.xlu0 %v2406_v43, %s2179_s18  ;;  %v482_v49 = vld [vmem:[#allocation13 + $0x60] sm:$0xff]  ;;  %v484_v50 = vld [vmem:[#allocation13 + $0x70] sm:$0xff]  ;;  %v283_v54 = vld [vmem:[%s2372_s11 + $0x18] sm:$0xff] }
  0x83   : > { %1687 = vmatpush1.bf16.msra.mxu1 %v1686_v27  ;;  %v2424_v52 = vpack.c.bf16 %v484_v50, %v482_v49  ;;  %v282_v53 = vld [vmem:[%s2372_s11 + $0x10] sm:$0xff]  ;;  %v284_v55 = vld [vmem:[%s2372_s11 + $0x20] sm:$0xff]  ;;  %v285_v56 = vld [vmem:[%s2372_s11 + $0x28] sm:$0xff] }
  0x84   : > { %1689 = vmatprep.subr.bf16.mxu1 %v1688_v31  ;;  %1747 = vmatpush1.bf16.msra.mxu0 %v2402_v39  ;;  %v286_v57 = vld [vmem:[%s2372_s11 + $0x30] sm:$0xff]  ;;  %v287_v58 = vld [vmem:[%s2372_s11 + $0x38] sm:$0xff]  ;;  %v2455_v59 = vld [vmem:[#allocation3] sm:$0xff]  ;;  %s1383_s11 = sadd.s32 6, %s2385_s8 }
  0x85   : > { %1749 = vmatprep.subr.bf16.mxu0 %v2404_v40  ;;  %v500_v60 = vld [vmem:[%s2736_s2] sm:$0xff] }
  0x86   : > { %502 = vperm.xlu1 %1929, %v500_v60   ;;  %v304_v12 = vld [vmem:[%s2739_s5] sm:$0x3] }
  0x87   : > { %1691 = vmatpush1.bf16.msra.mxu1 %v1690_v38  ;;  %v2497_v16 = vrot.slane %v304_v12, %v308_v11  ;;  %v2499_v17 = vrot.slane %v304_v12, %v312_v13 }
  0x88   : > { %1693 = vmatprep.subr.bf16.mxu1 %v2393_v25  ;;  %1751 = vmatpush1.bf16.msra.mxu0 %v2413_v47 }
  0x89   : > { %1753 = vmatprep.subr.bf16.mxu0 %v2416_v48 }
  0x8a   : > { %1638 = vmatmul.mubr.msk.f32.vlgmr.msra.gmra.mrb[0].mxu1 %vm316_vm1, %v280_v46 }
  0x8b   : > { %1695 = vmatpush1.bf16.msra.mxu1 %v2395_v29  ;;  %411 = vmatprep.mubr.f32.mxu1 %v2178_v8 }
  0x8c   : > { %1697 = vmatprep.subr.bf16.mxu1 %v2397_v33  ;;  %1755 = vmatpush1.bf16.msra.mxu0 %v2424_v52 }
  0x8d   : > { %1757 = vmatprep.subr.bf16.mxu0 %v2393_v25 }
  0x8e   : > { %1639 = vmatmul.mubr.msk.f32.gmra.mrb[2].mxu1 %vm316_vm1, %v281_v51  ;;  %v617_v51 = vstv %s2385_s8 }
  0x8f   : > { %417 = vmatprep.mubr.f32.mxu1 %v2178_v8  ;;  %1699 = vmatpush1.bf16.msra.mxu1 %v2402_v39 }
  0x90   : > { %1701 = vmatprep.subr.bf16.mxu1 %v2404_v40 }
  0x92   : > { %1640 = vmatmul.mubr.msk.f32.gmra.mrb[4].mxu1 %vm316_vm1, %v282_v53  ;;  %v618_v53 = vstv %s616_s13 }
  0x93   : > { %423 = vmatprep.mubr.f32.mxu1 %v2178_v8  ;;  %1703 = vmatpush1.bf16.msra.mxu1 %v2413_v47 }
  0x94   : > { %1705 = vmatprep.subr.bf16.mxu1 %v2416_v48 }
  0x96   : > { %1641 = vmatmul.mubr.msk.f32.gmra.mrb[6].mxu1 %vm316_vm1, %v283_v54 }
  0x97   : > { %429 = vmatprep.mubr.f32.mxu1 %v2178_v8  ;;  %1707 = vmatpush1.bf16.msra.mxu1 %v2424_v52 }
  0x98   : > { %1709 = vmatprep.subr.bf16.mxu1 %v2393_v25 }
  0x9a   : > { %1642 = vmatmul.mubr.msk.f32.gmra.mrb[8].mxu1 %vm316_vm1, %v284_v55  ;;  %v619_v55 = vsel %vm499_vm3, %v617_v51, %v618_v53 }
  0x9b   : > { %435 = vmatprep.mubr.f32.mxu1 %v2178_v8 }
  0x9e   : > { %1643 = vmatmul.mubr.msk.f32.gmra.mrb[10].mxu1 %vm316_vm1, %v285_v56 }
  0x9f   : > { %441 = vmatprep.mubr.f32.mxu1 %v2178_v8 }
  0xa2   : > { %1644 = vmatmul.mubr.msk.f32.gmra.mrb[12].mxu1 %vm316_vm1, %v286_v57 }
  0xa3   : > { %447 = vmatprep.mubr.f32.mxu1 %v2178_v8 }
  0xa6   : > { %1645 = vmatmul.mubr.msk.f32.gmra.mrb[14].mxu1 %vm316_vm1, %v287_v58 }
  0xa7   : > { %576 = vmatprep.mubr.f32.mxu1 %v2178_v8 }
  0xaa   : > { %1646 = vmatmul.mubr.msk.f32.vlgmr.msra.gmra.mrb[0].mxu1 %vm316_vm1, %v2455_v59 }
  0xab   : > { %1711 = vmatpush1.bf16.msra.mxu1 %v2395_v29  ;;  %703 = vmatprep.mubr.f32.mxu1 %v2178_v8 }
  0xac   : > { %1713 = vmatprep.subr.bf16.mxu1 %v2397_v33 }
  0xaf   : > { %1715 = vmatpush1.bf16.msra.mxu1 %v2402_v39 }
  0xb0   : > { %1717 = vmatprep.subr.bf16.mxu1 %v2404_v40 }
  0xb3   : > { %1719 = vmatpush1.bf16.msra.mxu1 %v2413_v47 }
  0xb4   : > { %1721 = vmatprep.subr.bf16.mxu1 %v2416_v48 }
  0xb7   : > { %1723 = vmatpush1.bf16.msra.mxu1 %v2424_v52 }
  0xb8   : > { %1725 = vmatprep.subr.bf16.mxu1 %v2393_v25 }
  0xf4   : > { %v605_v42 = vpop.permute.xlu0 %604 }
 0x105   : > { %v2519_v54 = vpop.permute.xlu1 %502 }
 0x106   : > { %vm620_vm4 = vcmp.gt.s32.totalorder %v2519_v54, %v619_v55 }
 0x169   : > { %v2471_v62 = vpop.f32.mrb[6].mxu1 }
 0x16a   : > { %v2473_v63 = vpop.f32.mrb[7].mxu1 }
 0x16d   : > { %v2475_v0 = vpop.f32.mrb[8].mxu1 }
 0x16e   : > { %v2477_v1 = vpop.f32.mrb[9].mxu1 }
 0x171   : > { %v2479_v3 = vpop.f32.mrb[10].mxu1 }
 0x172   : > { %v2481_v4 = vpop.f32.mrb[11].mxu1 }
 0x175   : > { %v2485_v7 = vpop.f32.mrb[12].mxu1 }
 0x176   : > { %v2487_v9 = vpop.f32.mrb[13].mxu1 }
 0x179   : > { %v2493_v14 = vpop.f32.mrb[14].mxu1 }
 0x17a   : > { %v2495_v15 = vpop.f32.mrb[15].mxu1 }
 0x17d   : > { %v578_v18 = vpop.f32.mrb[0].mxu1 }
 0x17e   : > { %v1820_v19 = vadd.f32 %v578_v18, %v2497_v16  ;;  %v580_v22 = vpop.f32.mrb[1].mxu1 }
 0x17f   : > { %v1821_v23 = vadd.f32 %v580_v22, %v2499_v17 }
 0x180   : > { %v1647_v24 = vmul.f32 -1.442695, %v1820_v19 }
 0x181   : > { %v586_v26 = vmul.f32 %v1821_v23, %v2503_v21 }
 0x182   : > { %1931 = vpow2.f32 %v1647_v24 }
 0x183   : > { %v1648_v27 = vmul.f32 -1.442695, %v586_v26 }
 0x185   : > { %1933 = vpow2.f32 %v1648_v27 }
 0x18c   : > { %v1932_v28 = vpop.eup %1931 }
 0x18d   : > { %v593_v32 = vadd.f32 1.0, %v1932_v28 }
 0x18f   : > { %v1934_v30 = vpop.eup %1933 }
 0x190   : > { %v594_v31 = vadd.f32 1.0, %v1934_v30 }
 0x192   : > { %1935 = vrcp.f32 %v594_v31 }
 0x193   : > { %1937 = vrcp.f32 %v593_v32 }
 0x19c   : > { %v1936_v34 = vpop.eup %1935 }
 0x19d   : > { %v600_v36 = vmul.f32 %v1936_v34, %v2503_v21  ;;  %v1938_v38 = vpop.eup %1937 }
 0x19e   : > { %v607_v44 = vmul.f32 %v1938_v38, %v605_v42 }
 0x19f   : > { %v602_v37 = vsub.f32 %v600_v36, %v2509_v35  ;;  %v745_v36 = vstv %s743_s14 }
 0x1a1   : > { %v608_v41 = vmul.f32 %v1938_v38, %v602_v37 }
 0x1a3   : > { %610 = vrot.lane.b32.xlu0 %v608_v41, %s2179_s18 }
 0x215   : > { %v611_v45 = vpop.permute.xlu0 %610 }
 0x216   : > { %v613_v46 = vadd.f32 %v611_v45, %v607_v44  ;;  %v506_v44 = vld [vmem:[#allocation5] sm:$0xff] }
 0x218   : > { %1939 = vtanh.f32 %v613_v46  ;;  %627 = vrot.lane.b32.xlu0 %v613_v46, %s2179_s18 }
 0x222   : > { %v1940_v49 = vpop.eup %1939 }
 0x223   : > { %v615_v50 = vmul.f32 %v1940_v49, %v602_v37  ;;  %v746_v37 = vstv %s744_s16 }
 0x224   : > { %v747_v38 = vsel %vm499_vm3, %v745_v36, %v746_v37 }
 0x225   : > { %622 = vrot.lane.b32.xlu1 %v615_v50, %s2179_s18  ;;  %vm748_vm5 = vcmp.gt.s32.totalorder %v2519_v54, %v747_v38 }
 0x28a   : > { %v628_v56 = vpop.permute.xlu0 %627 }
 0x28b   : > { %v630_v57 = vsel %vm620_vm4, %v628_v56, %v2406_v43 }
 0x28c   : > { %731 = vrot.lane.b32.xlu1 %v630_v57, %s2179_s18 }
 0x297   : > { %v623_v58 = vpop.permute.xlu1 %622 }
 0x298   : > { %v625_v60 = vsel %vm620_vm4, %v623_v58, %v2455_v59  ;;  %v631_v45 = vadd.f32 %v623_v58, %v506_v44 }
 0x299   : > { %1649 = vmatmul.mubr.msk.f32.vlgmr.msra.gmra.mrb[2].mxu1 %vm316_vm1, %v625_v60 }
 0x29a   : > { %1727 = vmatpush1.bf16.msra.mxu1 %v2395_v29  ;;  %831 = vmatprep.mubr.f32.mxu1 %v2178_v8  ;;  %v632_v46 = vsel %vm620_vm4, %v631_v45, %v506_v44  ;;  %v428_v44 = vadd.f32 %v2473_v63, %v2499_v17 }
 0x29b   : > { %1729 = vmatprep.subr.bf16.mxu1 %v2397_v33 }
 0x29e   : > { %1731 = vmatpush1.bf16.msra.mxu1 %v2402_v39 }
 0x29f   : > { %1733 = vmatprep.subr.bf16.mxu1 %v2404_v40 }
 0x2a2   : > { %1735 = vmatpush1.bf16.msra.mxu1 %v2413_v47 }
 0x2a3   : > { %1737 = vmatprep.subr.bf16.mxu1 %v2416_v48 }
 0x2a6   : > { %1739 = vmatpush1.bf16.msra.mxu1 %v2424_v52 }
 0x2fe   : > { %v732_v27 = vpop.permute.xlu1 %731 }
 0x36c   : > { %v705_v43 = vpop.f32.mrb[2].mxu1 }
 0x36d   : > { %v1822_v59 = vadd.f32 %v705_v43, %v2497_v16  ;;  %v707_v61 = vpop.f32.mrb[3].mxu1 }
 0x36e   : > { %v1823_v2 = vadd.f32 %v707_v61, %v2499_v17 }
 0x36f   : > { %v1650_v6 = vmul.f32 -1.442695, %v1822_v59 }
 0x370   : > { %v713_v10 = vmul.f32 %v1823_v2, %v2503_v21 }
 0x371   : > { %1941 = vpow2.f32 %v1650_v6 }
 0x372   : > { %v1651_v11 = vmul.f32 -1.442695, %v713_v10 }
 0x374   : > { %1943 = vpow2.f32 %v1651_v11 }
 0x37b   : > { %v1942_v12 = vpop.eup %1941 }
 0x37c   : > { %v720_v19 = vadd.f32 1.0, %v1942_v12 }
 0x37e   : > { %v1944_v13 = vpop.eup %1943 }
 0x37f   : > { %v721_v18 = vadd.f32 1.0, %v1944_v13 }
 0x381   : > { %1945 = vrcp.f32 %v721_v18 }
 0x382   : > { %1947 = vrcp.f32 %v720_v19 }
 0x38b   : > { %v1946_v20 = vpop.eup %1945 }
 0x38c   : > { %v727_v22 = vmul.f32 %v1946_v20, %v2503_v21  ;;  %v1948_v24 = vpop.eup %1947 }
 0x38d   : > { %v734_v28 = vmul.f32 %v1948_v24, %v732_v27 }
 0x38e   : > { %v729_v23 = vsub.f32 %v727_v22, %v2509_v35 }
 0x390   : > { %v735_v26 = vmul.f32 %v1948_v24, %v729_v23 }
 0x392   : > { %737 = vrot.lane.b32.xlu0 %v735_v26, %s2179_s18 }
 0x404   : > { %v738_v30 = vpop.permute.xlu0 %737 }
 0x405   : > { %v740_v31 = vadd.f32 %v738_v30, %v734_v28  ;;  %v873_v28 = vstv %s871_s7  ;;  %v874_v30 = vstv %s872_s17 }
 0x407   : > { %1949 = vtanh.f32 %v740_v31  ;;  %755 = vrot.lane.b32.xlu0 %v740_v31, %s2179_s18  ;;  %v875_v31 = vsel %vm499_vm3, %v873_v28, %v874_v30  ;;  %v432_v30 = vadd.f32 %v2475_v0, %v2497_v16 }
 0x408   : > { %vm876_vm6 = vcmp.gt.s32.totalorder %v2519_v54, %v875_v31  ;;  %v434_v31 = vadd.f32 %v2477_v1, %v2499_v17 }
 0x411   : > { %v1950_v32 = vpop.eup %1949 }
 0x412   : > { %v742_v34 = vmul.f32 %v1950_v32, %v729_v23 }
 0x414   : > { %750 = vrot.lane.b32.xlu1 %v742_v34, %s2179_s18 }
 0x479   : > { %v756_v41 = vpop.permute.xlu0 %755 }
 0x47a   : > { %v758_v42 = vsel %vm748_vm5, %v756_v41, %v630_v57 }
 0x47b   : > { %859 = vrot.lane.b32.xlu1 %v758_v42, %s2179_s18 }
 0x486   : > { %v751_v49 = vpop.permute.xlu1 %750 }
 0x487   : > { %v753_v50 = vsel %vm748_vm5, %v751_v49, %v625_v60  ;;  %v759_v51 = vadd.f32 %v751_v49, %v632_v46 }
 0x488   : > { %1652 = vmatmul.mubr.msk.f32.vlgmr.msra.gmra.mrb[4].mxu1 %vm316_vm1, %v753_v50 }
 0x489   : > { %v760_v53 = vsel %vm748_vm5, %v759_v51, %v632_v46 }
 0x4ed   : > { %v860_v20 = vpop.permute.xlu1 %859 }
 0x55b   : > { %v833_v56 = vpop.f32.mrb[4].mxu1 }
 0x55c   : > { %v1824_v43 = vadd.f32 %v833_v56, %v2497_v16  ;;  %v835_v59 = vpop.f32.mrb[5].mxu1 }
 0x55d   : > { %v1825_v61 = vadd.f32 %v835_v59, %v2499_v17 }
 0x55e   : > { %v1653_v57 = vmul.f32 -1.442695, %v1824_v43 }
 0x55f   : > { %v841_v2 = vmul.f32 %v1825_v61, %v2503_v21 }
 0x560   : > { %1951 = vpow2.f32 %v1653_v57 }
 0x561   : > { %v1654_v6 = vmul.f32 -1.442695, %v841_v2 }
 0x563   : > { %1953 = vpow2.f32 %v1654_v6 }
 0x56a   : > { %v1952_v55 = vpop.eup %1951 }
 0x56b   : > { %v848_v60 = vadd.f32 1.0, %v1952_v55 }
 0x56d   : > { %v1954_v58 = vpop.eup %1953 }
 0x56e   : > { %v849_v10 = vadd.f32 1.0, %v1954_v58 }
 0x570   : > { %1955 = vrcp.f32 %v849_v10 }
 0x571   : > { %1957 = vrcp.f32 %v848_v60 }
 0x57a   : > { %v1956_v11 = vpop.eup %1955 }
 0x57b   : > { %v855_v12 = vmul.f32 %v1956_v11, %v2503_v21  ;;  %v1958_v18 = vpop.eup %1957 }
 0x57c   : > { %v862_v22 = vmul.f32 %v1958_v18, %v860_v20 }
 0x57d   : > { %v857_v13 = vsub.f32 %v855_v12, %v2509_v35 }
 0x57f   : > { %v863_v19 = vmul.f32 %v1958_v18, %v857_v13  ;;  %v1001_v18 = vstv %s999_s21 }
 0x581   : > { %865 = vrot.lane.b32.xlu0 %v863_v19, %s2179_s18  ;;  %v1002_v19 = vstv %s1000_s22 }
 0x582   : > { %v1003_v20 = vsel %vm499_vm3, %v1001_v18, %v1002_v19  ;;  %v440_v18 = vadd.f32 %v2481_v4, %v2499_v17 }
 0x583   : > { %vm1004_vm7 = vcmp.gt.s32.totalorder %v2519_v54, %v1003_v20 }
 0x5f3   : > { %v866_v23 = vpop.permute.xlu0 %865 }
 0x5f4   : > { %v868_v24 = vadd.f32 %v866_v23, %v862_v22 }
 0x5f6   : > { %1959 = vtanh.f32 %v868_v24  ;;  %883 = vrot.lane.b32.xlu0 %v868_v24, %s2179_s18 }
 0x600   : > { %v1960_v26 = vpop.eup %1959 }
 0x601   : > { %v870_v27 = vmul.f32 %v1960_v26, %v857_v13 }
 0x603   : > { %878 = vrot.lane.b32.xlu1 %v870_v27, %s2179_s18 }
 0x668   : > { %v884_v32 = vpop.permute.xlu0 %883 }
 0x669   : > { %v886_v34 = vsel %vm876_vm6, %v884_v32, %v758_v42  ;;  %v426_v42 = vadd.f32 %v2471_v62, %v2497_v16 }
 0x66a   : > { %987 = vrot.lane.b32.xlu1 %v886_v34, %s2179_s18 }
 0x675   : > { %v879_v36 = vpop.permute.xlu1 %878 }
 0x676   : > { %v881_v37 = vsel %vm876_vm6, %v879_v36, %v753_v50  ;;  %v887_v38 = vadd.f32 %v879_v36, %v760_v53 }
 0x677   : > { %1655 = vmatmul.mubr.msk.f32.vlgmr.msra.gmra.mrb[0].mxu0 %vm316_vm1, %v881_v37 }
 0x678   : > { %1759 = vmatpush1.bf16.msra.mxu0 %v2395_v29  ;;  %v888_v41 = vsel %vm876_vm6, %v887_v38, %v760_v53  ;;  %1087 = vmatprep.mubr.f32.mxu0 %v2178_v8 }
 0x679   : > { %1761 = vmatprep.subr.bf16.mxu0 %v2397_v33 }
 0x67c   : > { %1763 = vmatpush1.bf16.msra.mxu0 %v2402_v39 }
 0x67d   : > { %1765 = vmatprep.subr.bf16.mxu0 %v2404_v40 }
 0x680   : > { %1767 = vmatpush1.bf16.msra.mxu0 %v2413_v47 }
 0x681   : > { %1769 = vmatprep.subr.bf16.mxu0 %v2416_v48 }
 0x684   : > { %1771 = vmatpush1.bf16.msra.mxu0 %v2424_v52 }
 0x685   : > { %1773 = vmatprep.subr.bf16.mxu0 %v2393_v25 }
 0x6dc   : > { %v988_v58 = vpop.permute.xlu1 %987 }
 0x74a   : > { %v961_v45 = vpop.f32.mrb[0].mxu0 }
 0x74b   : > { %v966_v46 = vadd.f32 %v961_v45, %v426_v42  ;;  %v963_v49 = vpop.f32.mrb[1].mxu0 }
 0x74c   : > { %v967_v50 = vadd.f32 %v963_v49, %v428_v44 }
 0x74d   : > { %v1656_v51 = vmul.f32 -1.442695, %v966_v46 }
 0x74e   : > { %v969_v53 = vmul.f32 %v967_v50, %v2503_v21 }
 0x74f   : > { %1961 = vpow2.f32 %v1656_v51 }
 0x750   : > { %v1657_v56 = vmul.f32 -1.442695, %v969_v53 }
 0x752   : > { %1963 = vpow2.f32 %v1657_v56 }
 0x759   : > { %v1962_v43 = vpop.eup %1961 }
 0x75a   : > { %v976_v57 = vadd.f32 1.0, %v1962_v43 }
 0x75c   : > { %v1964_v59 = vpop.eup %1963 }
 0x75d   : > { %v977_v61 = vadd.f32 1.0, %v1964_v59 }
 0x75f   : > { %1965 = vrcp.f32 %v977_v61 }
 0x760   : > { %1967 = vrcp.f32 %v976_v57 }
 0x769   : > { %v1966_v62 = vpop.eup %1965 }
 0x76a   : > { %v983_v63 = vmul.f32 %v1966_v62, %v2503_v21  ;;  %v1968_v6 = vpop.eup %1967 }
 0x76b   : > { %v990_v10 = vmul.f32 %v1968_v6, %v988_v58 }
 0x76c   : > { %v985_v2 = vsub.f32 %v983_v63, %v2509_v35  ;;  %v1129_v63 = vstv %s1127_s23 }
 0x76e   : > { %v991_v55 = vmul.f32 %v1968_v6, %v985_v2 }
 0x770   : > { %993 = vrot.lane.b32.xlu0 %v991_v55, %s2179_s18 }
 0x7e2   : > { %v994_v60 = vpop.permute.xlu0 %993 }
 0x7e3   : > { %v996_v11 = vadd.f32 %v994_v60, %v990_v10 }
 0x7e5   : > { %1969 = vtanh.f32 %v996_v11  ;;  %1011 = vrot.lane.b32.xlu0 %v996_v11, %s2179_s18 }
 0x7ef   : > { %v1970_v12 = vpop.eup %1969 }
 0x7f0   : > { %v998_v13 = vmul.f32 %v1970_v12, %v985_v2  ;;  %v1130_v2 = vstv %s1128_s29 }
 0x7f1   : > { %v1131_v6 = vsel %vm499_vm3, %v1129_v63, %v1130_v2 }
 0x7f2   : > { %1006 = vrot.lane.b32.xlu1 %v998_v13, %s2179_s18  ;;  %vm1132_vm8 = vcmp.gt.s32.totalorder %v2519_v54, %v1131_v6  ;;  %v438_v13 = vadd.f32 %v2479_v3, %v2497_v16 }
 0x857   : > { %v1012_v22 = vpop.permute.xlu0 %1011 }
 0x858   : > { %v1014_v23 = vsel %vm1004_vm7, %v1012_v22, %v886_v34 }
 0x859   : > { %1115 = vrot.lane.b32.xlu1 %v1014_v23, %s2179_s18 }
 0x864   : > { %v1007_v24 = vpop.permute.xlu1 %1006 }
 0x865   : > { %v1009_v26 = vsel %vm1004_vm7, %v1007_v24, %v881_v37  ;;  %v1015_v27 = vadd.f32 %v1007_v24, %v888_v41 }
 0x866   : > { %1658 = vmatmul.mubr.msk.f32.vlgmr.msra.gmra.mrb[2].mxu0 %vm316_vm1, %v1009_v26 }
 0x867   : > { %1775 = vmatpush1.bf16.msra.mxu0 %v2395_v29  ;;  %v1016_v28 = vsel %vm1004_vm7, %v1015_v27, %v888_v41  ;;  %1215 = vmatprep.mubr.f32.mxu0 %v2178_v8 }
 0x868   : > { %1777 = vmatprep.subr.bf16.mxu0 %v2397_v33 }
 0x86b   : > { %1779 = vmatpush1.bf16.msra.mxu0 %v2402_v39 }
 0x86c   : > { %1781 = vmatprep.subr.bf16.mxu0 %v2404_v40 }
 0x86f   : > { %1783 = vmatpush1.bf16.msra.mxu0 %v2413_v47 }
 0x870   : > { %1785 = vmatprep.subr.bf16.mxu0 %v2416_v48 }
 0x873   : > { %1787 = vmatpush1.bf16.msra.mxu0 %v2424_v52 }
 0x874   : > { %1789 = vmatprep.subr.bf16.mxu0 %v2393_v25 }
 0x8cb   : > { %v1116_v56 = vpop.permute.xlu1 %1115 }
 0x939   : > { %v1089_v32 = vpop.f32.mrb[2].mxu0 }
 0x93a   : > { %v1094_v34 = vadd.f32 %v1089_v32, %v432_v30  ;;  %v1091_v36 = vpop.f32.mrb[3].mxu0 }
 0x93b   : > { %v1095_v37 = vadd.f32 %v1091_v36, %v434_v31 }
 0x93c   : > { %v1659_v38 = vmul.f32 -1.442695, %v1094_v34 }
 0x93d   : > { %v1097_v41 = vmul.f32 %v1095_v37, %v2503_v21 }
 0x93e   : > { %1971 = vpow2.f32 %v1659_v38 }
 0x93f   : > { %v1660_v42 = vmul.f32 -1.442695, %v1097_v41 }
 0x941   : > { %1973 = vpow2.f32 %v1660_v42 }
 0x948   : > { %v1972_v44 = vpop.eup %1971 }
 0x949   : > { %v1104_v49 = vadd.f32 1.0, %v1972_v44 }
 0x94b   : > { %v1974_v45 = vpop.eup %1973 }
 0x94c   : > { %v1105_v46 = vadd.f32 1.0, %v1974_v45 }
 0x94e   : > { %1975 = vrcp.f32 %v1105_v46  ;;  %v1257_v46 = vstv %s1255_s9 }
 0x94f   : > { %1977 = vrcp.f32 %v1104_v49  ;;  %v1258_v49 = vstv %s1256_s10 }
 0x958   : > { %v1976_v0 = vpop.eup %1975 }
 0x959   : > { %v1111_v1 = vmul.f32 %v1976_v0, %v2503_v21  ;;  %v1978_v51 = vpop.eup %1977  ;;  %v1259_v0 = vsel %vm499_vm3, %v1257_v46, %v1258_v49 }
 0x95a   : > { %v1118_v43 = vmul.f32 %v1978_v51, %v1116_v56  ;;  %vm1260_vm9 = vcmp.gt.s32.totalorder %v2519_v54, %v1259_v0 }
 0x95b   : > { %v1113_v50 = vsub.f32 %v1111_v1, %v2509_v35 }
 0x95d   : > { %v1119_v53 = vmul.f32 %v1978_v51, %v1113_v50 }
 0x95f   : > { %1121 = vrot.lane.b32.xlu0 %v1119_v53, %s2179_s18 }
 0x9d1   : > { %v1122_v59 = vpop.permute.xlu0 %1121 }
 0x9d2   : > { %v1124_v61 = vadd.f32 %v1122_v59, %v1118_v43  ;;  %v444_v59 = vadd.f32 %v2485_v7, %v2497_v16 }
 0x9d4   : > { %1979 = vtanh.f32 %v1124_v61  ;;  %1139 = vrot.lane.b32.xlu0 %v1124_v61, %s2179_s18 }
 0x9de   : > { %v1980_v57 = vpop.eup %1979 }
 0x9df   : > { %v1126_v62 = vmul.f32 %v1980_v57, %v1113_v50 }
 0x9e1   : > { %1134 = vrot.lane.b32.xlu1 %v1126_v62, %s2179_s18 }
 0xa46   : > { %v1140_v55 = vpop.permute.xlu0 %1139 }
 0xa47   : > { %v1142_v58 = vsel %vm1132_vm8, %v1140_v55, %v1014_v23 }
 0xa48   : > { %1243 = vrot.lane.b32.xlu1 %v1142_v58, %s2179_s18 }
 0xa53   : > { %v1135_v10 = vpop.permute.xlu1 %1134 }
 0xa54   : > { %v1137_v60 = vsel %vm1132_vm8, %v1135_v10, %v1009_v26  ;;  %v1143_v11 = vadd.f32 %v1135_v10, %v1016_v28 }
 0xa55   : > { %1661 = vmatmul.mubr.msk.f32.vlgmr.msra.gmra.mrb[4].mxu0 %vm316_vm1, %v1137_v60 }
 0xa56   : > { %1791 = vmatpush1.bf16.msra.mxu0 %v2395_v29  ;;  %v1144_v12 = vsel %vm1132_vm8, %v1143_v11, %v1016_v28  ;;  %1343 = vmatprep.mubr.f32.mxu0 %v2178_v8 }
 0xa57   : > { %1793 = vmatprep.subr.bf16.mxu0 %v2397_v33 }
 0xa5a   : > { %1795 = vmatpush1.bf16.msra.mxu0 %v2402_v39 }
 0xa5b   : > { %1797 = vmatprep.subr.bf16.mxu0 %v2404_v40 }
 0xa5e   : > { %1799 = vmatpush1.bf16.msra.mxu0 %v2413_v47 }
 0xa5f   : > { %1801 = vmatprep.subr.bf16.mxu0 %v2416_v48 }
 0xa62   : > { %1803 = vmatpush1.bf16.msra.mxu0 %v2424_v52 }
 0xa63   : > { %1805 = vmatprep.subr.bf16.mxu0 %v2393_v25 }
 0xaba   : > { %v1244_v37 = vpop.permute.xlu1 %1243 }
 0xb28   : > { %v1217_v19 = vpop.f32.mrb[4].mxu0 }
 0xb29   : > { %v1222_v20 = vadd.f32 %v1217_v19, %v438_v13  ;;  %v1219_v22 = vpop.f32.mrb[5].mxu0  ;;  %v1386_v19 = vstv %s1384_s28 }
 0xb2a   : > { %v1223_v23 = vadd.f32 %v1219_v22, %v440_v18  ;;  %v1385_v18 = vstv %s1383_s11 }
 0xb2b   : > { %v1662_v24 = vmul.f32 -1.442695, %v1222_v20  ;;  %v1387_v20 = vsel %vm499_vm3, %v1385_v18, %v1386_v19 }
 0xb2c   : > { %v1225_v26 = vmul.f32 %v1223_v23, %v2503_v21  ;;  %vm1388_vm10 = vcmp.gt.s32.totalorder %v2519_v54, %v1387_v20 }
 0xb2d   : > { %1981 = vpow2.f32 %v1662_v24 }
 0xb2e   : > { %v1663_v27 = vmul.f32 -1.442695, %v1225_v26 }
 0xb30   : > { %1983 = vpow2.f32 %v1663_v27 }
 0xb37   : > { %v1982_v28 = vpop.eup %1981 }
 0xb38   : > { %v1232_v25 = vadd.f32 1.0, %v1982_v28 }
 0xb3a   : > { %v1984_v30 = vpop.eup %1983 }
 0xb3b   : > { %v1233_v31 = vadd.f32 1.0, %v1984_v30  ;;  %v450_v30 = vadd.f32 %v2493_v14, %v2497_v16 }
 0xb3d   : > { %1985 = vrcp.f32 %v1233_v31  ;;  %v452_v31 = vadd.f32 %v2495_v15, %v2499_v17 }
 0xb3e   : > { %1987 = vrcp.f32 %v1232_v25 }
 0xb47   : > { %v1986_v3 = vpop.eup %1985 }
 0xb48   : > { %v1239_v4 = vmul.f32 %v1986_v3, %v2503_v21  ;;  %v1988_v34 = vpop.eup %1987 }
 0xb49   : > { %v1246_v38 = vmul.f32 %v1988_v34, %v1244_v37 }
 0xb4a   : > { %v1241_v32 = vsub.f32 %v1239_v4, %v2509_v35 }
 0xb4c   : > { %v1247_v36 = vmul.f32 %v1988_v34, %v1241_v32 }
 0xb4e   : > { %1249 = vrot.lane.b32.xlu0 %v1247_v36, %s2179_s18 }
 0xbc0   : > { %v1250_v41 = vpop.permute.xlu0 %1249 }
 0xbc1   : > { %v1252_v42 = vadd.f32 %v1250_v41, %v1246_v38 }
 0xbc3   : > { %1989 = vtanh.f32 %v1252_v42  ;;  %1267 = vrot.lane.b32.xlu0 %v1252_v42, %s2179_s18 }
 0xbcd   : > { %v1990_v44 = vpop.eup %1989 }
 0xbce   : > { %v1254_v45 = vmul.f32 %v1990_v44, %v1241_v32 }
 0xbd0   : > { %1262 = vrot.lane.b32.xlu1 %v1254_v45, %s2179_s18 }
 0xc35   : > { %v1268_v1 = vpop.permute.xlu0 %1267 }
 0xc36   : > { %v1270_v50 = vsel %vm1260_vm9, %v1268_v1, %v1142_v58 }
 0xc37   : > { %1371 = vrot.lane.b32.xlu1 %v1270_v50, %s2179_s18 }
 0xc42   : > { %v1263_v51 = vpop.permute.xlu1 %1262 }
 0xc43   : > { %v1265_v53 = vsel %vm1260_vm9, %v1263_v51, %v1137_v60  ;;  %v1271_v56 = vadd.f32 %v1263_v51, %v1144_v12 }
 0xc44   : > { %1664 = vmatmul.mubr.msk.f32.vlgmr.msra.gmra.mrb[6].mxu0 %vm316_vm1, %v1265_v53 }
 0xc45   : > { %1807 = vmatpush1.bf16.msra.mxu0 %v2395_v29  ;;  %v1272_v43 = vsel %vm1260_vm9, %v1271_v56, %v1144_v12  ;;  %1471 = vmatprep.mubr.f32.mxu0 %v2178_v8  ;;  %v446_v29 = vadd.f32 %v2487_v9, %v2499_v17 }
 0xc46   : > { %1809 = vmatprep.subr.bf16.mxu0 %v2397_v33 }
 0xc49   : > { %1811 = vmatpush1.bf16.msra.mxu0 %v2402_v39 }
 0xc4a   : > { %1813 = vmatprep.subr.bf16.mxu0 %v2404_v40 }
 0xc4d   : > { %1815 = vmatpush1.bf16.msra.mxu0 %v2413_v47 }
 0xc4e   : > { %1817 = vmatprep.subr.bf16.mxu0 %v2416_v48 }
 0xc51   : > { %1819 = vmatpush1.bf16.msra.mxu0 %v2424_v52 }
 0xca9   : > { %v1372_v58 = vpop.permute.xlu1 %1371 }
 0xd17   : > { %v1345_v61 = vpop.f32.mrb[6].mxu0 }
 0xd18   : > { %v1350_v8 = vadd.f32 %v1345_v61, %v444_v59  ;;  %v1347_v57 = vpop.f32.mrb[7].mxu0 }
 0xd19   : > { %v1351_v33 = vadd.f32 %v1347_v57, %v446_v29 }
 0xd1a   : > { %v1665_v62 = vmul.f32 -1.442695, %v1350_v8 }
 0xd1b   : > { %v1353_v39 = vmul.f32 %v1351_v33, %v2503_v21 }
 0xd1c   : > { %1991 = vpow2.f32 %v1665_v62 }
 0xd1d   : > { %v1666_v40 = vmul.f32 -1.442695, %v1353_v39 }
 0xd1f   : > { %1993 = vpow2.f32 %v1666_v40 }
 0xd26   : > { %v1992_v47 = vpop.eup %1991 }
 0xd27   : > { %v1360_v52 = vadd.f32 1.0, %v1992_v47 }
 0xd29   : > { %v1994_v48 = vpop.eup %1993 }
 0xd2a   : > { %v1361_v63 = vadd.f32 1.0, %v1994_v48 }
 0xd2c   : > { %1995 = vrcp.f32 %v1361_v63 }
 0xd2d   : > { %1997 = vrcp.f32 %v1360_v52 }
 0xd36   : > { %v1996_v7 = vpop.eup %1995 }
 0xd37   : > { %v1367_v9 = vmul.f32 %v1996_v7, %v2503_v21  ;;  %v1998_v6 = vpop.eup %1997 }
 0xd38   : > { %v1374_v10 = vmul.f32 %v1998_v6, %v1372_v58 }
 0xd39   : > { %v1369_v2 = vsub.f32 %v1367_v9, %v2509_v35 }
 0xd3b   : > { %v1375_v55 = vmul.f32 %v1998_v6, %v1369_v2 }
 0xd3d   : > { %1377 = vrot.lane.b32.xlu0 %v1375_v55, %s2179_s18 }
 0xdaf   : > { %v1378_v60 = vpop.permute.xlu0 %1377 }
 0xdb0   : > { %v1380_v11 = vadd.f32 %v1378_v60, %v1374_v10 }
 0xdb2   : > { %1999 = vtanh.f32 %v1380_v11  ;;  %1395 = vrot.lane.b32.xlu0 %v1380_v11, %s2179_s18 }
 0xdbc   : > { %v2000_v12 = vpop.eup %1999 }
 0xdbd   : > { %v1382_v13 = vmul.f32 %v2000_v12, %v1369_v2 }
 0xdbf   : > { %1390 = vrot.lane.b32.xlu1 %v1382_v13, %s2179_s18 }
 0xe24   : > { %v1396_v22 = vpop.permute.xlu0 %1395 }
 0xe25   : > { %v1398_v23 = vsel %vm1388_vm10, %v1396_v22, %v1270_v50 }
 0xe26   : > { %1499 = vrot.lane.b32.xlu1 %v1398_v23, %s2179_s18 }
 0xe31   : > { %v1391_v24 = vpop.permute.xlu1 %1390 }
 0xe32   : > { %v1393_v26 = vsel %vm1388_vm10, %v1391_v24, %v1265_v53  ;;  %v1399_v27 = vadd.f32 %v1391_v24, %v1272_v43  ;;  %v1513_v53 = vstv %s273_s27 }
 0xe33   : > { %1667 = vmatmul.mubr.msk.f32.vlgmr.msra.gmra.mrb[8].mxu0 %vm316_vm1, %v1393_v26 }
 0xe34   : > { %v1400_v28 = vsel %vm1388_vm10, %v1399_v27, %v1272_v43 }
 0xe98   : > { %v1500_v46 = vpop.permute.xlu1 %1499 }
 0xf06   : > { %v1473_v25 = vpop.f32.mrb[8].mxu0 }
 0xf07   : > { %v1478_v3 = vadd.f32 %v1473_v25, %v450_v30  ;;  %v1475_v4 = vpop.f32.mrb[9].mxu0 }
 0xf08   : > { %v1479_v32 = vadd.f32 %v1475_v4, %v452_v31 }
 0xf09   : > { %v1668_v34 = vmul.f32 -1.442695, %v1478_v3 }
 0xf0a   : > { %v1481_v36 = vmul.f32 %v1479_v32, %v2503_v21 }
 0xf0b   : > { %2001 = vpow2.f32 %v1668_v34 }
 0xf0c   : > { %v1669_v37 = vmul.f32 -1.442695, %v1481_v36 }
 0xf0e   : > { %2003 = vpow2.f32 %v1669_v37 }
 0xf15   : > { %v2002_v38 = vpop.eup %2001 }
 0xf16   : > { %v1488_v44 = vadd.f32 1.0, %v2002_v38 }
 0xf18   : > { %v2004_v41 = vpop.eup %2003 }
 0xf19   : > { %v1489_v42 = vadd.f32 1.0, %v2004_v41 }
 0xf1b   : > { %2005 = vrcp.f32 %v1489_v42 }
 0xf1c   : > { %2007 = vrcp.f32 %v1488_v44 }
 0xf25   : > { %v2006_v14 = vpop.eup %2005 }
 0xf26   : > { %v1495_v15 = vmul.f32 %v2006_v14, %v2503_v21  ;;  %v2008_v17 = vpop.eup %2007  ;;  %v1512_v21 = vstv %s1511_s19 }
 0xf27   : > { %v1502_v49 = vmul.f32 %v2008_v17, %v1500_v46 }
 0xf28   : > { %v1497_v16 = vsub.f32 %v1495_v15, %v2509_v35  ;;  %v1514_v35 = vsel %vm499_vm3, %v1512_v21, %v1513_v53 }
 0xf29   : > { %vm1515_vm11 = vcmp.gt.s32.totalorder %v2519_v54, %v1514_v35 }
 0xf2a   : > { %v1503_v45 = vmul.f32 %v2008_v17, %v1497_v16 }
 0xf2c   : > { %1505 = vrot.lane.b32.xlu0 %v1503_v45, %s2179_s18 }
 0xf9e   : > { %v1506_v0 = vpop.permute.xlu0 %1505 }
 0xf9f   : > { %v1508_v1 = vadd.f32 %v1506_v0, %v1502_v49 }
 0xfa1   : > { %2009 = vtanh.f32 %v1508_v1  ;;  %1522 = vrot.lane.b32.xlu0 %v1508_v1, %s2179_s18 }
 0xfab   : > { %v2010_v50 = vpop.eup %2009 }
 0xfac   : > { %v1510_v51 = vmul.f32 %v2010_v50, %v1497_v16 }
 0xfae   : > { %1517 = vrot.lane.b32.xlu1 %v1510_v51, %s2179_s18 }
0x1013   : > { %v1523_v56 = vpop.permute.xlu0 %1522 }
0x1014   : > { %v1525_v43 = vsel %vm1515_vm11, %v1523_v56, %v1398_v23 }
0x1015   : > { %1529 = vst.msk [vmem:[#allocation4] sm:$0xff] %vm316_vm1, %v1525_v43 }
0x1020   : > { %v1518_v59 = vpop.permute.xlu1 %1517 }
0x1021   : > { %v1520_v29 = vsel %vm1515_vm11, %v1518_v59, %v1393_v26  ;;  %v1526_v61 = vadd.f32 %v1518_v59, %v1400_v28 }
0x1022   : > { %1528 = vst.msk [vmem:[#allocation3] sm:$0xff] %vm316_vm1, %v1520_v29 }
0x1023   : > { %v1527_v8 = vsel %vm1515_vm11, %v1526_v61, %v1400_v28 }
0x1024   : > { %1530 = vst.msk [vmem:[#allocation5] sm:$0xff] %vm316_vm1, %v1527_v8 }
0x1025 PF: > { %p1670_p4 = scmp.ne.s32.totalorder %s2241_s0, 1 }
0x1026   : > { %v1535_v5 = vld [vmem:[%s2736_s2] sm:$0xff] (!%p1670_p4)  ;;  %v2182_v54 = vmov (!%p1670_p4), 0   ;;  %vm1546_vm12 = vcmask (!%p1670_p4), 523264  }
0x1027   : > { %1534 = sbr.rel (%p1670_p4) target bundleno = 4281 (0x10b9), region = 64  ;;  %2011 = vset.pattern.permute.xlu0 (!%p1670_p4), %v2182_v54  ;;  %v1536_v57 = vcvt.s32.f32 (!%p1670_p4), %v1535_v5 }
0x1029   : > { %v1537_v33 = vmax.f32 (!%p1670_p4), %v1536_v57, 1.0 }
0x102b   : > { %1541 = vperm.xlu0 (!%p1670_p4), %2011, %v1537_v33   ;;  %v1538_v39 = vld [vmem:[#allocation5] sm:$0xff] (!%p1670_p4) }
0x10aa   : > { %v1542_v62 = vpop.permute.xlu0 %1541 }
0x10ab   : > { %2012 = vrcp.f32 %v1542_v62 }
0x10b5   : > { %v2013_v40 = vpop.eup %2012 }
0x10b6   : > { %v1545_v47 = vmul.f32 %v2013_v40, %v1538_v39 }
0x10b8   : > { %1547 = vst.msk [vmem:[#allocation14] sm:$0xff] %vm1546_vm12, %v1545_v47 }
0x10b9 PF: > { %p1882_p5 = scmp.eq.s32.totalorder %s2241_s0, 1  ;;  %s2183_s18 = smov [#allocation14]  }
0x10ba   : > { %s1555_s26 = sshll.u32 %s2183_s18, 4  ;;  %s1556_s26 = int_to_ptr.vmem [resolvable:$true] %s1555_s26 }
0x10bb   : > { %s2100_s12 = scalar_lea.vmem %s1556_s26, 128  ;;  %p2107_p2 = scmp.lt.s32.totalorder %s1556_s26, %s1556_s26 }
0x10bc   : > { %p2101_p6 = scmp.ne.s32.totalorder %s1556_s26, %s2100_s12  ;;  %p2108_p11 = scmp.lt.s32.totalorder %s2100_s12, %s2100_s12 }
0x10be   : > { %p2102_p12 = pnand %p2101_p6, %p1882_p5  ;;  %p2109_p13 = por %p2108_p11, %p2107_p2 }
0x10c0   : > { %p2103_p0 = pneg %p2102_p12 }
0x10c2   : > { %p2110_p3 = pnand %p2109_p13, %p2103_p0 }
0x10c4   : > { %2113 = shalt.err (!%p2110_p3)
}
0x10c5   : > { %s2114_s14 = scalar_lea.hbm %s2740_s6, 128 }
0x10c6   : > { %p2115_p8 = scmp.ne.s32.totalorder %s2740_s6, %s2114_s14  ;;  %p2120_p9 = scmp.lt.u32.totalorder %s2114_s14, %s2740_s6 }
0x10c8   : > { %p2116_p7 = pnand %p2115_p8, %p1882_p5 }
0x10ca   : > { %p2117_p10 = pneg %p2116_p7 }
0x10cc   : > { %p2122_p1 = pnand %p2120_p9, %p2117_p10 }
0x10ce   : > { %2125 = shalt.err (!%p2122_p1)
}
0x10cf   : > { %1863 = dma.vmem_to_hbm [thread:$0]  (%p1882_p5), %s1556_s26, 128, %s2740_s6, [#allocation10]  }
0x10d0   : > { %2151 = dma.done.wait (%p1882_p5), [#allocation10], 128  }
0x10d1   : > { %2153 = vsyncadd (%p1882_p5), [#allocation10], 4294967168 }
0x10d2 PF: > { %p19_p4 = scmp.ge.s32.totalorder %s2316_s15, 4   ;;  %s2753_s23 = smov %s2160_s24 }
0x10d3   : > { %s2754_s24 = smov %s2164_s25  ;;  %s2755_s25 = smov %s2327_s20 }
0x10d4   : > { %s2756_s26 = smov %s2316_s15  ;;  %21 = sbr.rel (!%p19_p4) target bundleno = 7 (0x7), region = 104 }
0x10db   :  { %1568 = vsyncpa [#allocation9], 1 }
0x10dc   :  { %1570 = vsyncpa [#allocation9 + $0x1], 1 }
0x10dd   :  { %1571 = vsyncpa [#allocation12], 1 }
0x10de   :  { %1572 = vsyncpa [#allocation10], 1 }
0x10df   :  { %1574 = vsyncpa [#allocation10 + $0x1], 1 }

</bundles_post_ra>
